<compile_context>
chip_gen: v7x
topology: tpu7x:2x2x1
jax: 0.10.0
libtpu: 0.0.40
codegen_flags: <defaults>
</compile_context>

<pallas_src>
import functools

import jax
import jax.numpy as jnp
from jax import lax
from jax.experimental import pallas as pl
from jax.experimental.pallas import tpu as pltpu


# ----------------------------------------------------------------------------
# helpers / generation-aware budgets
# ----------------------------------------------------------------------------
def _round_up(x, m):
    return ((x + m - 1) // m) * m


@functools.lru_cache(maxsize=1)
def _hw_budget():
    """VMEM budgets / tile maxima derived from the TPU generation.

    v5e/v6e have 128 MiB physical VMEM -> raise the scoped limit and use bigger
    tiles.  v7x (64 MiB physical) or unknown/CPU-interpret stays conservative.
    """
    try:
        cap = int(pltpu.get_tpu_info().vmem_capacity_bytes)
    except Exception:  # not on a TPU (e.g. CPU interpret mode)
        cap = 64 * 1024 * 1024
    if cap >= 100 * 1024 * 1024:            # v5e / v6e class
        return dict(vmem_limit=48 << 20, attn_budget=24 << 20,
                    row_tile=512, hidden_tile=2048, tq_max=256, tk_max=1024)
    return dict(vmem_limit=24 << 20, attn_budget=12 << 20,
                row_tile=256, hidden_tile=1024, tq_max=256, tk_max=512)


def _compiler_params(dims):
    return pltpu.CompilerParams(dimension_semantics=dims,
                                vmem_limit_bytes=_hw_budget()["vmem_limit"])


def _pick_row_tile(m):
    """Row tile for the projection / linear / ffn kernels.

    Keeps tiles multiples of 8 and, when rows allow, >= 2 grid steps so both
    TensorCores of a v7x megacore get work.
    """
    max_tile = _hw_budget()["row_tile"]
    if m <= 8:
        return m, m
    if m <= max_tile:
        if m % 16 == 0:                     # split for megacore parallelism
            return m // 2, m
        return m, m
    return max_tile, _round_up(m, max_tile)


# ----------------------------------------------------------------------------
# Fused QKV projection: one kernel, three outputs (no weight concat, no slices)
# ----------------------------------------------------------------------------
def _qkv_proj_kernel(x_ref, wq_ref, wk_ref, wv_ref, q_ref, k_ref, v_ref):
    x = x_ref[...]                           # native dtype straight to the MXU
    q_ref[...] = jnp.dot(x, wq_ref[...],
                         preferred_element_type=jnp.float32).astype(q_ref.dtype)
    k_ref[...] = jnp.dot(x, wk_ref[...],
                         preferred_element_type=jnp.float32).astype(k_ref.dtype)
    v_ref[...] = jnp.dot(x, wv_ref[...],
                         preferred_element_type=jnp.float32).astype(v_ref.dtype)


def pallas_qkv_proj(x2d, w_q, w_k, w_v):
    """x2d: (M, d_model) -> q (M, H*dk), k (M, H*dk), v (M, H*dv)."""
    M, d_model = x2d.shape
    nq, nk, nv = w_q.shape[1], w_k.shape[1], w_v.shape[1]
    tm, m_pad = _pick_row_tile(M)
    if m_pad != M:
        x2d = jnp.pad(x2d, ((0, m_pad - M), (0, 0)))

    q, k, v = pl.pallas_call(
        _qkv_proj_kernel,
        out_shape=(jax.ShapeDtypeStruct((m_pad, nq), x2d.dtype),
                   jax.ShapeDtypeStruct((m_pad, nk), x2d.dtype),
                   jax.ShapeDtypeStruct((m_pad, nv), x2d.dtype)),
        grid_spec=pltpu.PrefetchScalarGridSpec(
            num_scalar_prefetch=0, grid=(m_pad // tm,),
            in_specs=[pl.BlockSpec((tm, d_model), lambda i: (i, 0)),
                      pl.BlockSpec((d_model, nq), lambda i: (0, 0)),
                      pl.BlockSpec((d_model, nk), lambda i: (0, 0)),
                      pl.BlockSpec((d_model, nv), lambda i: (0, 0))],
            out_specs=[pl.BlockSpec((tm, nq), lambda i: (i, 0)),
                       pl.BlockSpec((tm, nk), lambda i: (i, 0)),
                       pl.BlockSpec((tm, nv), lambda i: (i, 0))]),
        compiler_params=_compiler_params(("parallel",)),
    )(x2d, w_q, w_k, w_v)
    if m_pad != M:
        q, k, v = q[:M], k[:M], v[:M]
    return q, k, v


# ----------------------------------------------------------------------------
# Flash-style scaled dot product attention, heads sliced in-kernel
# ----------------------------------------------------------------------------
def _flash_attn_kernel(q_ref, k_ref, v_ref, o_ref, m_sc, l_sc, acc_sc, *,
                       n_head, d_k, d_v, lk_valid, tk, mask_k):
    ki = pl.program_id(2)

    @pl.when(ki == 0)
    def _init():
        m_sc[...] = jnp.full(m_sc.shape, -jnp.inf, dtype=jnp.float32)
        l_sc[...] = jnp.zeros(l_sc.shape, dtype=jnp.float32)
        acc_sc[...] = jnp.zeros(acc_sc.shape, dtype=jnp.float32)

    q = q_ref[0]            # (tq, H*d_k); 1/temperature folded into w_q
    k = k_ref[0]            # (tk, H*d_k)
    v = v_ref[0]            # (tk, H*d_v)

    if mask_k:
        # Only taken when Lk is not a multiple of tk.  The wrapper asserts
        # padding < tk, so every k-tile keeps >= 1 valid column and the online
        # max stays finite.
        col = ki * tk + lax.broadcasted_iota(jnp.int32, (1, tk), 1)
        kbias = jnp.where(col < lk_valid, 0.0, -1e30).astype(jnp.float32)

    for h in range(n_head):                 # static unroll, all work in VMEM
        qh = q[:, h * d_k:(h + 1) * d_k]
        kh = k[:, h * d_k:(h + 1) * d_k]
        vh = v[:, h * d_v:(h + 1) * d_v]
        # scores = q_h @ k_h^T without materializing a transposed K copy.
        s = lax.dot_general(qh, kh, (((1,), (1,)), ((), ())),
                            preferred_element_type=jnp.float32)   # (tq, tk)
        if mask_k:
            s = s + kbias

        m_prev = m_sc[h]
        m_new = jnp.maximum(m_prev, s.max(axis=-1, keepdims=True))
        alpha = jnp.exp(m_prev - m_new)
        p = jnp.exp(s - m_new)
        l_sc[h] = alpha * l_sc[h] + p.sum(axis=-1, keepdims=True)
        acc_sc[h] = alpha * acc_sc[h] + jnp.dot(
            p.astype(vh.dtype), vh, preferred_element_type=jnp.float32)
        m_sc[h] = m_new

    # TODO(synk): attention-prob nn.Dropout(0.1) is identity in eval mode.

    @pl.when(ki == pl.num_programs(2) - 1)
    def _finalize():
        outs = []
        for h in range(n_head):
            # Exact divide (once per output tile); the approx EUP reciprocal
            # previously cost ~9e-3 of output error.
            outs.append(acc_sc[h] / l_sc[h])
        # Concatenate heads in VMEM so the store is one lane-dense slab of
        # width H*d_v (= d_model) instead of per-head masked stores.
        o_ref[0] = jnp.concatenate(outs, axis=-1).astype(o_ref.dtype)


def flash_attention(q3, k3, v3, *, n_head, d_k, d_v):
    """q3: (B, Lq, H*d_k), k3: (B, Lk, H*d_k), v3: (B, Lk, H*d_v)
       -> (B, Lq, H*d_v).  No head transposes; attention probabilities are
       never written back (the Encoder discards them)."""
    B, Lq, hdk = q3.shape
    _, Lk, hdv = v3.shape
    cfg = _hw_budget()
    itemsize = q3.dtype.itemsize

    tq = min(cfg["tq_max"], _round_up(Lq, 8))
    tk = min(cfg["tk_max"], _round_up(Lk, 8))

    def step_bytes(tq_, tk_):
        blocks = itemsize * (tq_ * hdk + tk_ * hdk + tk_ * hdv + tq_ * hdv)
        # f32 accumulator + lane-padded (tq,1)->(tq,128) m/l scratches.
        scratch = 4 * (n_head * tq_ * d_v + 2 * n_head * tq_ * 128)
        return 2 * blocks + scratch          # x2: double-buffered pipeline

    while step_bytes(tq, tk) > cfg["attn_budget"] and tk > 128:
        tk = max(128, tk // 2)
    while step_bytes(tq, tk) > cfg["attn_budget"] and tq > 128:
        tq = max(128, tq // 2)

    lq_pad = _round_up(Lq, tq)
    lk_pad = _round_up(Lk, tk)
    if lq_pad != Lq:
        q3 = jnp.pad(q3, ((0, 0), (0, lq_pad - Lq), (0, 0)))
    if lk_pad != Lk:
        k3 = jnp.pad(k3, ((0, 0), (0, lk_pad - Lk), (0, 0)))
        v3 = jnp.pad(v3, ((0, 0), (0, lk_pad - Lk), (0, 0)))
    mask_k = lk_pad != Lk
    assert lk_pad - Lk < tk  # every k-tile keeps >= 1 valid column

    grid = (B, lq_pad // tq, lk_pad // tk)
    kernel = functools.partial(_flash_attn_kernel, n_head=n_head, d_k=d_k,
                               d_v=d_v, lk_valid=Lk, tk=tk, mask_k=mask_k)

    out = pl.pallas_call(
        kernel,
        out_shape=jax.ShapeDtypeStruct((B, lq_pad, hdv), q3.dtype),
        grid_spec=pltpu.PrefetchScalarGridSpec(
            num_scalar_prefetch=0, grid=grid,
            in_specs=[
                pl.BlockSpec((1, tq, hdk), lambda b, qi, ki: (b, qi, 0)),
                pl.BlockSpec((1, tk, hdk), lambda b, qi, ki: (b, ki, 0)),
                pl.BlockSpec((1, tk, hdv), lambda b, qi, ki: (b, ki, 0)),
            ],
            out_specs=pl.BlockSpec((1, tq, hdv), lambda b, qi, ki: (b, qi, 0)),
            scratch_shapes=[
                pltpu.VMEM((n_head, tq, 1), jnp.float32),    # running max
                pltpu.VMEM((n_head, tq, 1), jnp.float32),    # running denom
                pltpu.VMEM((n_head, tq, d_v), jnp.float32),  # output accum
            ]),
        compiler_params=_compiler_params(("parallel", "parallel", "arbitrary")),
    )(q3, k3, v3)

    if lq_pad != Lq:
        out = out[:, :Lq, :]
    return out


# ----------------------------------------------------------------------------
# Fused linear: y = x @ W (+ residual)    (used for the fc projection)
# ----------------------------------------------------------------------------
def _linear_kernel(*refs, has_residual):
    it = iter(refs)
    x_ref = next(it)
    w_ref = next(it)
    r_ref = next(it) if has_residual else None
    o_ref = next(it)
    y = jnp.dot(x_ref[...], w_ref[...], preferred_element_type=jnp.float32)
    if has_residual:
        y = y + r_ref[...].astype(jnp.float32)
    # TODO(synk): nn.Dropout after fc is identity in eval mode.
    o_ref[...] = y.astype(o_ref.dtype)


def pallas_linear(x2d, w, residual=None):
    M, K = x2d.shape
    N = w.shape[1]
    tm, m_pad = _pick_row_tile(M)
    if m_pad != M:
        x2d = jnp.pad(x2d, ((0, m_pad - M), (0, 0)))
        if residual is not None:
            residual = jnp.pad(residual, ((0, m_pad - M), (0, 0)))

    in_specs = [pl.BlockSpec((tm, K), lambda i: (i, 0)),
                pl.BlockSpec((K, N), lambda i: (0, 0))]
    args = [x2d, w]
    if residual is not None:
        in_specs.append(pl.BlockSpec((tm, N), lambda i: (i, 0)))
        args.append(residual)

    kernel = functools.partial(_linear_kernel,
                               has_residual=residual is not None)
    out = pl.pallas_call(
        kernel,
        out_shape=jax.ShapeDtypeStruct((m_pad, N), x2d.dtype),
        grid_spec=pltpu.PrefetchScalarGridSpec(
            num_scalar_prefetch=0, grid=(m_pad // tm,),
            in_specs=in_specs,
            out_specs=pl.BlockSpec((tm, N), lambda i: (i, 0))),
        compiler_params=_compiler_params(("parallel",)),
    )(*args)
    return out[:M] if m_pad != M else out


# ----------------------------------------------------------------------------
# Fused position-wise feed-forward with tiled hidden dim:
#   relu(x@W1+b1)@W2 + b2 + x
# ----------------------------------------------------------------------------
def _ffn_kernel(x_ref, w1_ref, b1_ref, w2_ref, b2_ref, o_ref, acc_ref):
    j = pl.program_id(1)

    @pl.when(j == 0)
    def _init():
        acc_ref[...] = jnp.zeros_like(acc_ref)

    x = x_ref[...]
    h = jnp.dot(x, w1_ref[...], preferred_element_type=jnp.float32)
    h = jnp.maximum(h + b1_ref[...].astype(jnp.float32), 0.0)
    acc_ref[...] += jnp.dot(h.astype(x.dtype), w2_ref[...],
                            preferred_element_type=jnp.float32)

    @pl.when(j == pl.num_programs(1) - 1)
    def _finalize():
        y = acc_ref[...] + b2_ref[...].astype(jnp.float32) + x.astype(jnp.float32)
        # TODO(synk): nn.Dropout after w_2 is identity in eval mode.
        o_ref[...] = y.astype(o_ref.dtype)


def pallas_ffn(x2d, w1, b1, w2, b2):
    M, d_in = x2d.shape
    d_hid = w1.shape[1]
    cfg = _hw_budget()
    tm, m_pad = _pick_row_tile(M)
    if m_pad != M:
        x2d = jnp.pad(x2d, ((0, m_pad - M), (0, 0)))

    # Tile the hidden dim so W1/W2 never need to be fully resident (the f32
    # d_model=1024/d_inner=4096 pair would not fit v7x's 64 MiB otherwise).
    th = d_hid if d_hid <= cfg["hidden_tile"] else cfg["hidden_tile"]
    h_pad = _round_up(d_hid, th)
    if h_pad != d_hid:  # zero-pad: relu(0+0)=0 contributes nothing
        w1 = jnp.pad(w1, ((0, 0), (0, h_pad - d_hid)))
        b1 = jnp.pad(b1, ((0, h_pad - d_hid),))
        w2 = jnp.pad(w2, ((0, h_pad - d_hid), (0, 0)))

    out = pl.pallas_call(
        _ffn_kernel,
        out_shape=jax.ShapeDtypeStruct((m_pad, d_in), x2d.dtype),
        grid_spec=pltpu.PrefetchScalarGridSpec(
            num_scalar_prefetch=0, grid=(m_pad // tm, h_pad // th),
            in_specs=[
                pl.BlockSpec((tm, d_in), lambda i, j: (i, 0)),
                pl.BlockSpec((d_in, th), lambda i, j: (0, j)),
                pl.BlockSpec((1, th), lambda i, j: (0, j)),
                pl.BlockSpec((th, d_in), lambda i, j: (j, 0)),
                pl.BlockSpec((1, d_in), lambda i, j: (0, 0)),
            ],
            out_specs=pl.BlockSpec((tm, d_in), lambda i, j: (i, 0)),
            scratch_shapes=[pltpu.VMEM((tm, d_in), jnp.float32)]),
        compiler_params=_compiler_params(("parallel", "arbitrary")),
    )(x2d, w1, b1.reshape(1, -1), w2, b2.reshape(1, d_in))
    return out[:M] if m_pad != M else out


# ----------------------------------------------------------------------------
# Encoder forward (Pallas kernels + pure-metadata reshapes only)
# ----------------------------------------------------------------------------
def _mha_forward(p, x, *, n_head, d_k, d_v):
    B, L, d_model = x.shape
    x2d = x.reshape(B * L, d_model)

    # One projection kernel -> q/k/v (1/sqrt(d_k) already folded into w_q).
    q2d, k2d, v2d = pallas_qkv_proj(x2d, p["w_q"], p["w_k"], p["w_v"])

    # Pure-metadata reshapes; heads are sliced inside the attention kernel so
    # the old (B, L, H, d) <-> (B, H, L, d) HBM transposes are gone.
    q3 = q2d.reshape(B, L, n_head * d_k)
    k3 = k2d.reshape(B, L, n_head * d_k)
    v3 = v2d.reshape(B, L, n_head * d_v)

    o3 = flash_attention(q3, k3, v3, n_head=n_head, d_k=d_k, d_v=d_v)
    o2d = o3.reshape(B * L, n_head * d_v)

    # fc (no bias) + dropout(identity, eval) + residual, fused in one kernel.
    y = pallas_linear(o2d, p["fc"], residual=x2d)
    return y.reshape(B, L, d_model)


def encoder_forward(params, x, *, n_head, d_k, d_v):
    """x: (bs, num_views, d_model) -> (bs, num_views, d_model).

    Matches Encoder.forward(return_attns=False) with norm=False (the default).
    """
    # TODO(synk): the norm=True LayerNorm path of the module is not implemented
    # (module default is norm=False).
    out = x
    for p in params["layers"]:
        out = _mha_forward(p, out, n_head=n_head, d_k=d_k, d_v=d_v)
        B, L, d_model = out.shape
        out = pallas_ffn(out.reshape(B * L, d_model),
                         p["w_1"], p["b_1"], p["w_2"], p["b_2"]
                         ).reshape(B, L, d_model)
    return out


def prepare_encoder_params(params, *, d_k):
    """One-time parameter prep: fold 1/temperature into the q projection."""
    scale = 1.0 / (float(d_k) ** 0.5)
    layers = []
    for p in params["layers"]:
        layers.append(dict(
            w_q=p["w_qs"] * scale,
            w_k=p["w_ks"],
            w_v=p["w_vs"],
            fc=p["fc"],
            w_1=p["w_1"], b_1=p["b_1"], w_2=p["w_2"], b_2=p["b_2"],
        ))
    return dict(layers=layers)


# ----------------------------------------------------------------------------
# Pure-JAX reference + param init + self-test
# ----------------------------------------------------------------------------
def reference_encoder(params, x, *, n_head, d_k, d_v):
    B, L, d_model = x.shape
    with jax.default_matmul_precision("float32"):
        out = x
        for p in params["layers"]:
            residual = out
            q = (out @ p["w_qs"]).reshape(B, L, n_head, d_k).transpose(0, 2, 1, 3)
            k = (out @ p["w_ks"]).reshape(B, L, n_head, d_k).transpose(0, 2, 1, 3)
            v = (out @ p["w_vs"]).reshape(B, L, n_head, d_v).transpose(0, 2, 1, 3)
            scores = jnp.einsum("bhqd,bhkd->bhqk", q / (float(d_k) ** 0.5), k)
            attn = jax.nn.softmax(scores, axis=-1)
            o = jnp.einsum("bhqk,bhkd->bhqd", attn, v)
            o = o.transpose(0, 2, 1, 3).reshape(B, L, n_head * d_v)
            out = o @ p["fc"] + residual
            residual = out
            h = jax.nn.relu(out @ p["w_1"] + p["b_1"])
            out = h @ p["w_2"] + p["b_2"] + residual
    return out


def init_params(key, n_layers, n_head, d_k, d_v, d_model, d_inner):
    def lin(k, fan_in, fan_out):
        return (jax.random.normal(k, (fan_in, fan_out), jnp.float32)
                / jnp.sqrt(float(fan_in)))

    layers = []
    for _ in range(n_layers):
        key, *ks = jax.random.split(key, 10)
        layers.append(dict(
            w_qs=lin(ks[0], d_model, n_head * d_k),
            w_ks=lin(ks[1], d_model, n_head * d_k),
            w_vs=lin(ks[2], d_model, n_head * d_v),
            fc=lin(ks[3], n_head * d_v, d_model),
            w_1=lin(ks[4], d_model, d_inner),
            b_1=0.02 * jax.random.normal(ks[5], (d_inner,), jnp.float32),
            w_2=lin(ks[6], d_inner, d_model),
            b_2=0.02 * jax.random.normal(ks[7], (d_model,), jnp.float32),
        ))
    return dict(layers=layers)


if __name__ == "__main__":
    B, L = 2, 8                 # (bs, num_views)
    n_layers, n_head = 2, 2
    d_k = d_v = 16
    d_model, d_inner = 32, 64

    key = jax.random.PRNGKey(0)
    key, pkey, xkey = jax.random.split(key, 3)
    params = init_params(pkey, n_layers, n_head, d_k, d_v, d_model, d_inner)
    feats_embedding = jax.random.normal(xkey, (B, L, d_model), jnp.float32)

    prepped = prepare_encoder_params(params, d_k=d_k)

    enc = jax.jit(functools.partial(encoder_forward,
                                    n_head=n_head, d_k=d_k, d_v=d_v))
    out = enc(prepped, feats_embedding)
    jax.block_until_ready(out)

    ref = reference_encoder(params, feats_embedding,
                            n_head=n_head, d_k=d_k, d_v=d_v)
    assert out.shape == (B, L, d_model)
    max_err = float(jnp.max(jnp.abs(out - ref)))
    assert jnp.allclose(out, ref, atol=2e-3, rtol=2e-3), max_err

    print("KERNEL_OK")
</pallas_src>

<mosaic_0001>
module attributes {stable_mosaic.version = 11 : i64} {
  func.func @_qkv_proj_kernel(%arg0: i32, %arg1: memref<8x32xf32, #tpu.memory_space<vmem>>, %arg2: memref<32x32xf32, #tpu.memory_space<vmem>>, %arg3: memref<32x32xf32, #tpu.memory_space<vmem>>, %arg4: memref<32x32xf32, #tpu.memory_space<vmem>>, %arg5: memref<8x32xf32, #tpu.memory_space<vmem>>, %arg6: memref<8x32xf32, #tpu.memory_space<vmem>>, %arg7: memref<8x32xf32, #tpu.memory_space<vmem>>) attributes {dimension_semantics = [#tpu.dimension_semantics<parallel>], iteration_bounds = array<i64: 2>, scalar_prefetch = 0 : i64, scratch_operands = 0 : i64, tpu.core_type = #tpu.core_type<tc>, window_params = [{transform_indices = @transform_0, window_bounds = array<i64: 8, 32>}, {pipeline_mode = #tpu.pipeline_mode<synchronous>, transform_indices = @transform_1, window_bounds = array<i64: 32, 32>}, {pipeline_mode = #tpu.pipeline_mode<synchronous>, transform_indices = @transform_2, window_bounds = array<i64: 32, 32>}, {pipeline_mode = #tpu.pipeline_mode<synchronous>, transform_indices = @transform_3, window_bounds = array<i64: 32, 32>}, {transform_indices = @transform_4, window_bounds = array<i64: 8, 32>}, {transform_indices = @transform_5, window_bounds = array<i64: 8, 32>}, {transform_indices = @transform_6, window_bounds = array<i64: 8, 32>}]} {
    %c0 = arith.constant 0 : index
    %c0_0 = arith.constant 0 : index
    %0 = vector.load %arg1[%c0, %c0_0] : memref<8x32xf32, #tpu.memory_space<vmem>>, vector<8x32xf32>
    %c0_1 = arith.constant 0 : index
    %c0_2 = arith.constant 0 : index
    %1 = vector.load %arg2[%c0_1, %c0_2] : memref<32x32xf32, #tpu.memory_space<vmem>>, vector<32x32xf32>
    %cst = arith.constant dense<0.000000e+00> : vector<8x32xf32>
    %2 = tpu.matmul %0, %1, %cst {dimension_numbers = #tpu.dot_dimension_numbers<[1], [0], [0], [1], [0, 0, 1, 1], [], []>} : vector<8x32xf32>, vector<32x32xf32>, vector<8x32xf32> -> vector<8x32xf32>
    %c0_3 = arith.constant 0 : index
    %c0_4 = arith.constant 0 : index
    %3 = vector.load %arg5[%c0_3, %c0_4] : memref<8x32xf32, #tpu.memory_space<vmem>>, vector<8x32xf32>
    tpu.vector_store %arg5[%c0_3, %c0_4], %2 {strides = array<i32>} : memref<8x32xf32, #tpu.memory_space<vmem>>, vector<8x32xf32>,
    %c0_5 = arith.constant 0 : index
    %c0_6 = arith.constant 0 : index
    %4 = vector.load %arg3[%c0_5, %c0_6] : memref<32x32xf32, #tpu.memory_space<vmem>>, vector<32x32xf32>
    %cst_7 = arith.constant dense<0.000000e+00> : vector<8x32xf32>
    %5 = tpu.matmul %0, %4, %cst_7 {dimension_numbers = #tpu.dot_dimension_numbers<[1], [0], [0], [1], [0, 0, 1, 1], [], []>} : vector<8x32xf32>, vector<32x32xf32>, vector<8x32xf32> -> vector<8x32xf32>
    %c0_8 = arith.constant 0 : index
    %c0_9 = arith.constant 0 : index
    %6 = vector.load %arg6[%c0_8, %c0_9] : memref<8x32xf32, #tpu.memory_space<vmem>>, vector<8x32xf32>
    tpu.vector_store %arg6[%c0_8, %c0_9], %5 {strides = array<i32>} : memref<8x32xf32, #tpu.memory_space<vmem>>, vector<8x32xf32>,
    %c0_10 = arith.constant 0 : index
    %c0_11 = arith.constant 0 : index
    %7 = vector.load %arg4[%c0_10, %c0_11] : memref<32x32xf32, #tpu.memory_space<vmem>>, vector<32x32xf32>
    %cst_12 = arith.constant dense<0.000000e+00> : vector<8x32xf32>
    %8 = tpu.matmul %0, %7, %cst_12 {dimension_numbers = #tpu.dot_dimension_numbers<[1], [0], [0], [1], [0, 0, 1, 1], [], []>} : vector<8x32xf32>, vector<32x32xf32>, vector<8x32xf32> -> vector<8x32xf32>
    %c0_13 = arith.constant 0 : index
    %c0_14 = arith.constant 0 : index
    %9 = vector.load %arg7[%c0_13, %c0_14] : memref<8x32xf32, #tpu.memory_space<vmem>>, vector<8x32xf32>
    tpu.vector_store %arg7[%c0_13, %c0_14], %8 {strides = array<i32>} : memref<8x32xf32, #tpu.memory_space<vmem>>, vector<8x32xf32>,
    return
  }
  func.func @transform_0(%arg0: i32) -> (i32, i32) {
    %c0_i32 = arith.constant 0 : i32
    %c0_i32_0 = arith.constant 0 : i32
    return %arg0, %c0_i32 : i32, i32
  }
  func.func @transform_1(%arg0: i32) -> (i32, i32) {
    %c0_i32 = arith.constant 0 : i32
    %c0_i32_0 = arith.constant 0 : i32
    %c0_i32_1 = arith.constant 0 : i32
    return %c0_i32, %c0_i32_0 : i32, i32
  }
  func.func @transform_2(%arg0: i32) -> (i32, i32) {
    %c0_i32 = arith.constant 0 : i32
    %c0_i32_0 = arith.constant 0 : i32
    %c0_i32_1 = arith.constant 0 : i32
    return %c0_i32, %c0_i32_0 : i32, i32
  }
  func.func @transform_3(%arg0: i32) -> (i32, i32) {
    %c0_i32 = arith.constant 0 : i32
    %c0_i32_0 = arith.constant 0 : i32
    %c0_i32_1 = arith.constant 0 : i32
    return %c0_i32, %c0_i32_0 : i32, i32
  }
  func.func @transform_4(%arg0: i32) -> (i32, i32) {
    %c0_i32 = arith.constant 0 : i32
    %c0_i32_0 = arith.constant 0 : i32
    return %arg0, %c0_i32 : i32, i32
  }
  func.func @transform_5(%arg0: i32) -> (i32, i32) {
    %c0_i32 = arith.constant 0 : i32
    %c0_i32_0 = arith.constant 0 : i32
    return %arg0, %c0_i32 : i32, i32
  }
  func.func @transform_6(%arg0: i32) -> (i32, i32) {
    %c0_i32 = arith.constant 0 : i32
    %c0_i32_0 = arith.constant 0 : i32
    return %arg0, %c0_i32 : i32, i32
  }
}

module attributes {stable_mosaic.version = 11 : i64} {
  func.func @_linear_kernel(%arg0: i32, %arg1: memref<8x32xf32, #tpu.memory_space<vmem>>, %arg2: memref<32x32xf32, #tpu.memory_space<vmem>>, %arg3: memref<8x32xf32, #tpu.memory_space<vmem>>, %arg4: memref<8x32xf32, #tpu.memory_space<vmem>>) attributes {dimension_semantics = [#tpu.dimension_semantics<parallel>], iteration_bounds = array<i64: 2>, scalar_prefetch = 0 : i64, scratch_operands = 0 : i64, tpu.core_type = #tpu.core_type<tc>, window_params = [{transform_indices = @transform_0, window_bounds = array<i64: 8, 32>}, {pipeline_mode = #tpu.pipeline_mode<synchronous>, transform_indices = @transform_1, window_bounds = array<i64: 32, 32>}, {transform_indices = @transform_2, window_bounds = array<i64: 8, 32>}, {transform_indices = @transform_3, window_bounds = array<i64: 8, 32>}]} {
    %c0 = arith.constant 0 : index
    %c0_0 = arith.constant 0 : index
    %0 = vector.load %arg1[%c0, %c0_0] : memref<8x32xf32, #tpu.memory_space<vmem>>, vector<8x32xf32>
    %c0_1 = arith.constant 0 : index
    %c0_2 = arith.constant 0 : index
    %1 = vector.load %arg2[%c0_1, %c0_2] : memref<32x32xf32, #tpu.memory_space<vmem>>, vector<32x32xf32>
    %cst = arith.constant dense<0.000000e+00> : vector<8x32xf32>
    %2 = tpu.matmul %0, %1, %cst {dimension_numbers = #tpu.dot_dimension_numbers<[1], [0], [0], [1], [0, 0, 1, 1], [], []>} : vector<8x32xf32>, vector<32x32xf32>, vector<8x32xf32> -> vector<8x32xf32>
    %c0_3 = arith.constant 0 : index
    %c0_4 = arith.constant 0 : index
    %3 = vector.load %arg3[%c0_3, %c0_4] : memref<8x32xf32, #tpu.memory_space<vmem>>, vector<8x32xf32>
    %4 = arith.addf %2, %3 : vector<8x32xf32>
    %c0_5 = arith.constant 0 : index
    %c0_6 = arith.constant 0 : index
    %5 = vector.load %arg4[%c0_5, %c0_6] : memref<8x32xf32, #tpu.memory_space<vmem>>, vector<8x32xf32>
    tpu.vector_store %arg4[%c0_5, %c0_6], %4 {strides = array<i32>} : memref<8x32xf32, #tpu.memory_space<vmem>>, vector<8x32xf32>,
    return
  }
  func.func @transform_0(%arg0: i32) -> (i32, i32) {
    %c0_i32 = arith.constant 0 : i32
    %c0_i32_0 = arith.constant 0 : i32
    return %arg0, %c0_i32 : i32, i32
  }
  func.func @transform_1(%arg0: i32) -> (i32, i32) {
    %c0_i32 = arith.constant 0 : i32
    %c0_i32_0 = arith.constant 0 : i32
    %c0_i32_1 = arith.constant 0 : i32
    return %c0_i32, %c0_i32_0 : i32, i32
  }
  func.func @transform_2(%arg0: i32) -> (i32, i32) {
    %c0_i32 = arith.constant 0 : i32
    %c0_i32_0 = arith.constant 0 : i32
    return %arg0, %c0_i32 : i32, i32
  }
  func.func @transform_3(%arg0: i32) -> (i32, i32) {
    %c0_i32 = arith.constant 0 : i32
    %c0_i32_0 = arith.constant 0 : i32
    return %arg0, %c0_i32 : i32, i32
  }
}

module attributes {stable_mosaic.version = 11 : i64} {
  func.func @_flash_attn_kernel(%arg0: i32, %arg1: i32, %arg2: i32, %arg3: memref<1x8x32xf32, #tpu.memory_space<vmem>>, %arg4: memref<1x8x32xf32, #tpu.memory_space<vmem>>, %arg5: memref<1x8x32xf32, #tpu.memory_space<vmem>>, %arg6: memref<1x8x32xf32, #tpu.memory_space<vmem>>, %arg7: memref<2x8x1xf32, #tpu.memory_space<vmem>>, %arg8: memref<2x8x1xf32, #tpu.memory_space<vmem>>, %arg9: memref<2x8x16xf32, #tpu.memory_space<vmem>>) attributes {dimension_semantics = [#tpu.dimension_semantics<parallel>, #tpu.dimension_semantics<parallel>, #tpu.dimension_semantics<arbitrary>], iteration_bounds = array<i64: 2, 1, 1>, scalar_prefetch = 0 : i64, scratch_operands = 3 : i64, tpu.core_type = #tpu.core_type<tc>, window_params = [{transform_indices = @transform_0, window_bounds = array<i64: 1, 8, 32>}, {transform_indices = @transform_1, window_bounds = array<i64: 1, 8, 32>}, {transform_indices = @transform_2, window_bounds = array<i64: 1, 8, 32>}, {transform_indices = @transform_3, window_bounds = array<i64: 1, 8, 32>}]} {
    %c0_i32 = arith.constant 0 : i32
    %0 = arith.cmpi eq, %arg2, %c0_i32 : i32
    %1 = arith.extui %0 : i1 to i32
    %c0_i32_0 = arith.constant 0 : i32
    %2 = arith.cmpi ne, %1, %c0_i32_0 : i32
    scf.if %2 {
      %cst_53 = arith.constant 0xFF800000 : f32
      %82 = vector.broadcast %cst_53 : f32 to vector<2x8x1xf32>
      %c0_54 = arith.constant 0 : index
      %c0_55 = arith.constant 0 : index
      %c0_56 = arith.constant 0 : index
      %83 = vector.load %arg7[%c0_54, %c0_55, %c0_56] : memref<2x8x1xf32, #tpu.memory_space<vmem>>, vector<2x8x1xf32>
      tpu.vector_store %arg7[%c0_54, %c0_55, %c0_56], %82 {strides = array<i32>} : memref<2x8x1xf32, #tpu.memory_space<vmem>>, vector<2x8x1xf32>,
      %cst_57 = arith.constant 0.000000e+00 : f32
      %84 = vector.broadcast %cst_57 : f32 to vector<2x8x1xf32>
      %c0_58 = arith.constant 0 : index
      %c0_59 = arith.constant 0 : index
      %c0_60 = arith.constant 0 : index
      %85 = vector.load %arg8[%c0_58, %c0_59, %c0_60] : memref<2x8x1xf32, #tpu.memory_space<vmem>>, vector<2x8x1xf32>
      tpu.vector_store %arg8[%c0_58, %c0_59, %c0_60], %84 {strides = array<i32>} : memref<2x8x1xf32, #tpu.memory_space<vmem>>, vector<2x8x1xf32>,
      %cst_61 = arith.constant 0.000000e+00 : f32
      %86 = vector.broadcast %cst_61 : f32 to vector<2x8x16xf32>
      %c0_62 = arith.constant 0 : index
      %c0_63 = arith.constant 0 : index
      %c0_64 = arith.constant 0 : index
      %87 = vector.load %arg9[%c0_62, %c0_63, %c0_64] : memref<2x8x16xf32, #tpu.memory_space<vmem>>, vector<2x8x16xf32>
      tpu.vector_store %arg9[%c0_62, %c0_63, %c0_64], %86 {strides = array<i32>} : memref<2x8x16xf32, #tpu.memory_space<vmem>>, vector<2x8x16xf32>,
    } else {
    }
    %c0 = arith.constant 0 : index
    %c0_1 = arith.constant 0 : index
    %c0_2 = arith.constant 0 : index
    %3 = vector.load %arg3[%c0, %c0_1, %c0_2] : memref<1x8x32xf32, #tpu.memory_space<vmem>>, vector<1x8x32xf32>
    %4 = vector.shape_cast %3 : vector<1x8x32xf32> to vector<8x32xf32>
    %c0_3 = arith.constant 0 : index
    %c0_4 = arith.constant 0 : index
    %c0_5 = arith.constant 0 : index
    %5 = vector.load %arg4[%c0_3, %c0_4, %c0_5] : memref<1x8x32xf32, #tpu.memory_space<vmem>>, vector<1x8x32xf32>
    %6 = vector.shape_cast %5 : vector<1x8x32xf32> to vector<8x32xf32>
    %c0_6 = arith.constant 0 : index
    %c0_7 = arith.constant 0 : index
    %c0_8 = arith.constant 0 : index
    %7 = vector.load %arg5[%c0_6, %c0_7, %c0_8] : memref<1x8x32xf32, #tpu.memory_space<vmem>>, vector<1x8x32xf32>
    %8 = vector.shape_cast %7 : vector<1x8x32xf32> to vector<8x32xf32>
    %9 = vector.extract_strided_slice %4 {offsets = [0, 0], sizes = [8, 16], strides = [1, 1]} : vector<8x32xf32> to vector<8x16xf32>
    %10 = vector.extract_strided_slice %6 {offsets = [0, 0], sizes = [8, 16], strides = [1, 1]} : vector<8x32xf32> to vector<8x16xf32>
    %11 = vector.extract_strided_slice %8 {offsets = [0, 0], sizes = [8, 16], strides = [1, 1]} : vector<8x32xf32> to vector<8x16xf32>
    %cst = arith.constant dense<0.000000e+00> : vector<8x8xf32>
    %12 = tpu.matmul %9, %10, %cst {dimension_numbers = #tpu.dot_dimension_numbers<[1], [1], [0], [0], [0, 0, 1, 0], [], []>} : vector<8x16xf32>, vector<8x16xf32>, vector<8x8xf32> -> vector<8x8xf32>
    %c0_9 = arith.constant 0 : index
    %c0_10 = arith.constant 0 : index
    %c0_11 = arith.constant 0 : index
    %13 = vector.load %arg7[%c0_9, %c0_10, %c0_11] : memref<2x8x1xf32, #tpu.memory_space<vmem>>, vector<1x8x1xf32>
    %14 = vector.shape_cast %13 : vector<1x8x1xf32> to vector<8x1xf32>
    %cst_12 = arith.constant dense<0xFF800000> : vector<8xf32>
    %15 = vector.multi_reduction <maximumf>, %12, %cst_12 [1] : vector<8x8xf32> to vector<8xf32>
    %16 = vector.shape_cast %15 : vector<8xf32> to vector<8x1xf32>
    %17 = arith.maximumf %14, %16 : vector<8x1xf32>
    %18 = arith.subf %14, %17 : vector<8x1xf32>
    %19 = math.exp %18 : vector<8x1xf32>
    %20 = vector.broadcast %17 : vector<8x1xf32> to vector<8x8xf32>
    %21 = arith.subf %12, %20 : vector<8x8xf32>
    %22 = math.exp %21 : vector<8x8xf32>
    %c0_13 = arith.constant 0 : index
    %c0_14 = arith.constant 0 : index
    %c0_15 = arith.constant 0 : index
    %23 = vector.load %arg8[%c0_13, %c0_14, %c0_15] : memref<2x8x1xf32, #tpu.memory_space<vmem>>, vector<1x8x1xf32>
    %24 = vector.shape_cast %23 : vector<1x8x1xf32> to vector<8x1xf32>
    %25 = arith.mulf %19, %24 : vector<8x1xf32>
    %cst_16 = arith.constant dense<0.000000e+00> : vector<8xf32>
    %26 = vector.multi_reduction <add>, %22, %cst_16 [1] : vector<8x8xf32> to vector<8xf32>
    %27 = vector.shape_cast %26 : vector<8xf32> to vector<8x1xf32>
    %28 = arith.addf %25, %27 : vector<8x1xf32>
    %c0_17 = arith.constant 0 : index
    %c0_18 = arith.constant 0 : index
    %c0_19 = arith.constant 0 : index
    %29 = vector.load %arg8[%c0_17, %c0_18, %c0_19] : memref<2x8x1xf32, #tpu.memory_space<vmem>>, vector<1x8x1xf32>
    %30 = vector.shape_cast %29 : vector<1x8x1xf32> to vector<8x1xf32>
    %31 = vector.shape_cast %28 : vector<8x1xf32> to vector<1x8x1xf32>
    tpu.vector_store %arg8[%c0_17, %c0_18, %c0_19], %31 {strides = array<i32>} : memref<2x8x1xf32, #tpu.memory_space<vmem>>, vector<1x8x1xf32>,
    %c0_20 = arith.constant 0 : index
    %c0_21 = arith.constant 0 : index
    %c0_22 = arith.constant 0 : index
    %32 = vector.load %arg9[%c0_20, %c0_21, %c0_22] : memref<2x8x16xf32, #tpu.memory_space<vmem>>, vector<1x8x16xf32>
    %33 = vector.shape_cast %32 : vector<1x8x16xf32> to vector<8x16xf32>
    %34 = vector.broadcast %19 : vector<8x1xf32> to vector<8x16xf32>
    %35 = arith.mulf %34, %33 : vector<8x16xf32>
    %cst_23 = arith.constant dense<0.000000e+00> : vector<8x16xf32>
    %36 = tpu.matmul %22, %11, %cst_23 {dimension_numbers = #tpu.dot_dimension_numbers<[1], [0], [0], [1], [0, 0, 1, 1], [], []>} : vector<8x8xf32>, vector<8x16xf32>, vector<8x16xf32> -> vector<8x16xf32>
    %37 = arith.addf %35, %36 : vector<8x16xf32>
    %c0_24 = arith.constant 0 : index
    %c0_25 = arith.constant 0 : index
    %c0_26 = arith.constant 0 : index
    %38 = vector.load %arg9[%c0_24, %c0_25, %c0_26] : memref<2x8x16xf32, #tpu.memory_space<vmem>>, vector<1x8x16xf32>
    %39 = vector.shape_cast %38 : vector<1x8x16xf32> to vector<8x16xf32>
    %40 = vector.shape_cast %37 : vector<8x16xf32> to vector<1x8x16xf32>
    tpu.vector_store %arg9[%c0_24, %c0_25, %c0_26], %40 {strides = array<i32>} : memref<2x8x16xf32, #tpu.memory_space<vmem>>, vector<1x8x16xf32>,
    %c0_27 = arith.constant 0 : index
    %c0_28 = arith.constant 0 : index
    %c0_29 = arith.constant 0 : index
    %41 = vector.load %arg7[%c0_27, %c0_28, %c0_29] : memref<2x8x1xf32, #tpu.memory_space<vmem>>, vector<1x8x1xf32>
    %42 = vector.shape_cast %41 : vector<1x8x1xf32> to vector<8x1xf32>
    %43 = vector.shape_cast %17 : vector<8x1xf32> to vector<1x8x1xf32>
    tpu.vector_store %arg7[%c0_27, %c0_28, %c0_29], %43 {strides = array<i32>} : memref<2x8x1xf32, #tpu.memory_space<vmem>>, vector<1x8x1xf32>,
    %44 = vector.extract_strided_slice %4 {offsets = [0, 16], sizes = [8, 16], strides = [1, 1]} : vector<8x32xf32> to vector<8x16xf32>
    %45 = vector.extract_strided_slice %6 {offsets = [0, 16], sizes = [8, 16], strides = [1, 1]} : vector<8x32xf32> to vector<8x16xf32>
    %46 = vector.extract_strided_slice %8 {offsets = [0, 16], sizes = [8, 16], strides = [1, 1]} : vector<8x32xf32> to vector<8x16xf32>
    %cst_30 = arith.constant dense<0.000000e+00> : vector<8x8xf32>
    %47 = tpu.matmul %44, %45, %cst_30 {dimension_numbers = #tpu.dot_dimension_numbers<[1], [1], [0], [0], [0, 0, 1, 0], [], []>} : vector<8x16xf32>, vector<8x16xf32>, vector<8x8xf32> -> vector<8x8xf32>
    %c1 = arith.constant 1 : index
    %c0_31 = arith.constant 0 : index
    %c0_32 = arith.constant 0 : index
    %48 = vector.load %arg7[%c1, %c0_31, %c0_32] : memref<2x8x1xf32, #tpu.memory_space<vmem>>, vector<1x8x1xf32>
    %49 = vector.shape_cast %48 : vector<1x8x1xf32> to vector<8x1xf32>
    %cst_33 = arith.constant dense<0xFF800000> : vector<8xf32>
    %50 = vector.multi_reduction <maximumf>, %47, %cst_33 [1] : vector<8x8xf32> to vector<8xf32>
    %51 = vector.shape_cast %50 : vector<8xf32> to vector<8x1xf32>
    %52 = arith.maximumf %49, %51 : vector<8x1xf32>
    %53 = arith.subf %49, %52 : vector<8x1xf32>
    %54 = math.exp %53 : vector<8x1xf32>
    %55 = vector.broadcast %52 : vector<8x1xf32> to vector<8x8xf32>
    %56 = arith.subf %47, %55 : vector<8x8xf32>
    %57 = math.exp %56 : vector<8x8xf32>
    %c1_34 = arith.constant 1 : index
    %c0_35 = arith.constant 0 : index
    %c0_36 = arith.constant 0 : index
    %58 = vector.load %arg8[%c1_34, %c0_35, %c0_36] : memref<2x8x1xf32, #tpu.memory_space<vmem>>, vector<1x8x1xf32>
    %59 = vector.shape_cast %58 : vector<1x8x1xf32> to vector<8x1xf32>
    %60 = arith.mulf %54, %59 : vector<8x1xf32>
    %cst_37 = arith.constant dense<0.000000e+00> : vector<8xf32>
    %61 = vector.multi_reduction <add>, %57, %cst_37 [1] : vector<8x8xf32> to vector<8xf32>
    %62 = vector.shape_cast %61 : vector<8xf32> to vector<8x1xf32>
    %63 = arith.addf %60, %62 : vector<8x1xf32>
    %c1_38 = arith.constant 1 : index
    %c0_39 = arith.constant 0 : index
    %c0_40 = arith.constant 0 : index
    %64 = vector.load %arg8[%c1_38, %c0_39, %c0_40] : memref<2x8x1xf32, #tpu.memory_space<vmem>>, vector<1x8x1xf32>
    %65 = vector.shape_cast %64 : vector<1x8x1xf32> to vector<8x1xf32>
    %66 = vector.shape_cast %63 : vector<8x1xf32> to vector<1x8x1xf32>
    tpu.vector_store %arg8[%c1_38, %c0_39, %c0_40], %66 {strides = array<i32>} : memref<2x8x1xf32, #tpu.memory_space<vmem>>, vector<1x8x1xf32>,
    %c1_41 = arith.constant 1 : index
    %c0_42 = arith.constant 0 : index
    %c0_43 = arith.constant 0 : index
    %67 = vector.load %arg9[%c1_41, %c0_42, %c0_43] : memref<2x8x16xf32, #tpu.memory_space<vmem>>, vector<1x8x16xf32>
    %68 = vector.shape_cast %67 : vector<1x8x16xf32> to vector<8x16xf32>
    %69 = vector.broadcast %54 : vector<8x1xf32> to vector<8x16xf32>
    %70 = arith.mulf %69, %68 : vector<8x16xf32>
    %cst_44 = arith.constant dense<0.000000e+00> : vector<8x16xf32>
    %71 = tpu.matmul %57, %46, %cst_44 {dimension_numbers = #tpu.dot_dimension_numbers<[1], [0], [0], [1], [0, 0, 1, 1], [], []>} : vector<8x8xf32>, vector<8x16xf32>, vector<8x16xf32> -> vector<8x16xf32>
    %72 = arith.addf %70, %71 : vector<8x16xf32>
    %c1_45 = arith.constant 1 : index
    %c0_46 = arith.constant 0 : index
    %c0_47 = arith.constant 0 : index
    %73 = vector.load %arg9[%c1_45, %c0_46, %c0_47] : memref<2x8x16xf32, #tpu.memory_space<vmem>>, vector<1x8x16xf32>
    %74 = vector.shape_cast %73 : vector<1x8x16xf32> to vector<8x16xf32>
    %75 = vector.shape_cast %72 : vector<8x16xf32> to vector<1x8x16xf32>
    tpu.vector_store %arg9[%c1_45, %c0_46, %c0_47], %75 {strides = array<i32>} : memref<2x8x16xf32, #tpu.memory_space<vmem>>, vector<1x8x16xf32>,
    %c1_48 = arith.constant 1 : index
    %c0_49 = arith.constant 0 : index
    %c0_50 = arith.constant 0 : index
    %76 = vector.load %arg7[%c1_48, %c0_49, %c0_50] : memref<2x8x1xf32, #tpu.memory_space<vmem>>, vector<1x8x1xf32>
    %77 = vector.shape_cast %76 : vector<1x8x1xf32> to vector<8x1xf32>
    %78 = vector.shape_cast %52 : vector<8x1xf32> to vector<1x8x1xf32>
    tpu.vector_store %arg7[%c1_48, %c0_49, %c0_50], %78 {strides = array<i32>} : memref<2x8x1xf32, #tpu.memory_space<vmem>>, vector<1x8x1xf32>,
    %c0_i32_51 = arith.constant 0 : i32
    %79 = arith.cmpi eq, %arg2, %c0_i32_51 : i32
    %80 = arith.extui %79 : i1 to i32
    %c0_i32_52 = arith.constant 0 : i32
    %81 = arith.cmpi ne, %80, %c0_i32_52 : i32
    scf.if %81 {
      %c0_53 = arith.constant 0 : index
      %c0_54 = arith.constant 0 : index
      %c0_55 = arith.constant 0 : index
      %82 = vector.load %arg9[%c0_53, %c0_54, %c0_55] : memref<2x8x16xf32, #tpu.memory_space<vmem>>, vector<1x8x16xf32>
      %83 = vector.shape_cast %82 : vector<1x8x16xf32> to vector<8x16xf32>
      %c0_56 = arith.constant 0 : index
      %c0_57 = arith.constant 0 : index
      %c0_58 = arith.constant 0 : index
      %84 = vector.load %arg8[%c0_56, %c0_57, %c0_58] : memref<2x8x1xf32, #tpu.memory_space<vmem>>, vector<1x8x1xf32>
      %85 = vector.shape_cast %84 : vector<1x8x1xf32> to vector<8x1xf32>
      %86 = vector.broadcast %85 : vector<8x1xf32> to vector<8x16xf32>
      %87 = arith.divf %83, %86 : vector<8x16xf32>
      %c1_59 = arith.constant 1 : index
      %c0_60 = arith.constant 0 : index
      %c0_61 = arith.constant 0 : index
      %88 = vector.load %arg9[%c1_59, %c0_60, %c0_61] : memref<2x8x16xf32, #tpu.memory_space<vmem>>, vector<1x8x16xf32>
      %89 = vector.shape_cast %88 : vector<1x8x16xf32> to vector<8x16xf32>
      %c1_62 = arith.constant 1 : index
      %c0_63 = arith.constant 0 : index
      %c0_64 = arith.constant 0 : index
      %90 = vector.load %arg8[%c1_62, %c0_63, %c0_64] : memref<2x8x1xf32, #tpu.memory_space<vmem>>, vector<1x8x1xf32>
      %91 = vector.shape_cast %90 : vector<1x8x1xf32> to vector<8x1xf32>
      %92 = vector.broadcast %91 : vector<8x1xf32> to vector<8x16xf32>
      %93 = arith.divf %89, %92 : vector<8x16xf32>
      %94 = tpu.concatenate %87, %93 in 1 : vector<8x16xf32>, vector<8x16xf32> -> vector<8x32xf32>
      %c0_65 = arith.constant 0 : index
      %c0_66 = arith.constant 0 : index
      %c0_67 = arith.constant 0 : index
      %95 = vector.load %arg6[%c0_65, %c0_66, %c0_67] : memref<1x8x32xf32, #tpu.memory_space<vmem>>, vector<1x8x32xf32>
      %96 = vector.shape_cast %95 : vector<1x8x32xf32> to vector<8x32xf32>
      %97 = vector.shape_cast %94 : vector<8x32xf32> to vector<1x8x32xf32>
      tpu.vector_store %arg6[%c0_65, %c0_66, %c0_67], %97 {strides = array<i32>} : memref<1x8x32xf32, #tpu.memory_space<vmem>>, vector<1x8x32xf32>,
    } else {
    }
    return
  }
  func.func @transform_0(%arg0: i32, %arg1: i32, %arg2: i32) -> (i32, i32, i32) {
    %c0_i32 = arith.constant 0 : i32
    %c0_i32_0 = arith.constant 0 : i32
    return %arg0, %arg1, %c0_i32 : i32, i32, i32
  }
  func.func @transform_1(%arg0: i32, %arg1: i32, %arg2: i32) -> (i32, i32, i32) {
    %c0_i32 = arith.constant 0 : i32
    %c0_i32_0 = arith.constant 0 : i32
    return %arg0, %arg2, %c0_i32 : i32, i32, i32
  }
  func.func @transform_2(%arg0: i32, %arg1: i32, %arg2: i32) -> (i32, i32, i32) {
    %c0_i32 = arith.constant 0 : i32
    %c0_i32_0 = arith.constant 0 : i32
    return %arg0, %arg2, %c0_i32 : i32, i32, i32
  }
  func.func @transform_3(%arg0: i32, %arg1: i32, %arg2: i32) -> (i32, i32, i32) {
    %c0_i32 = arith.constant 0 : i32
    %c0_i32_0 = arith.constant 0 : i32
    return %arg0, %arg1, %c0_i32 : i32, i32, i32
  }
}

module attributes {stable_mosaic.version = 11 : i64} {
  func.func @_ffn_kernel(%arg0: i32, %arg1: i32, %arg2: memref<8x32xf32, #tpu.memory_space<vmem>>, %arg3: memref<32x64xf32, #tpu.memory_space<vmem>>, %arg4: memref<1x64xf32, #tpu.memory_space<vmem>>, %arg5: memref<64x32xf32, #tpu.memory_space<vmem>>, %arg6: memref<1x32xf32, #tpu.memory_space<vmem>>, %arg7: memref<8x32xf32, #tpu.memory_space<vmem>>, %arg8: memref<8x32xf32, #tpu.memory_space<vmem>>) attributes {dimension_semantics = [#tpu.dimension_semantics<parallel>, #tpu.dimension_semantics<arbitrary>], iteration_bounds = array<i64: 2, 1>, scalar_prefetch = 0 : i64, scratch_operands = 1 : i64, tpu.core_type = #tpu.core_type<tc>, window_params = [{transform_indices = @transform_0, window_bounds = array<i64: 8, 32>}, {transform_indices = @transform_1, window_bounds = array<i64: 32, 64>}, {transform_indices = @transform_2, window_bounds = array<i64: 1, 64>}, {transform_indices = @transform_3, window_bounds = array<i64: 64, 32>}, {pipeline_mode = #tpu.pipeline_mode<synchronous>, transform_indices = @transform_4, window_bounds = array<i64: 1, 32>}, {transform_indices = @transform_5, window_bounds = array<i64: 8, 32>}]} {
    %c0_i32 = arith.constant 0 : i32
    %0 = arith.cmpi eq, %arg1, %c0_i32 : i32
    %1 = arith.extui %0 : i1 to i32
    %c0_i32_0 = arith.constant 0 : i32
    %2 = arith.cmpi ne, %1, %c0_i32_0 : i32
    scf.if %2 {
      %cst_16 = arith.constant 0.000000e+00 : f32
      %19 = vector.broadcast %cst_16 : f32 to vector<8x32xf32>
      %c0_17 = arith.constant 0 : index
      %c0_18 = arith.constant 0 : index
      %20 = vector.load %arg8[%c0_17, %c0_18] : memref<8x32xf32, #tpu.memory_space<vmem>>, vector<8x32xf32>
      tpu.vector_store %arg8[%c0_17, %c0_18], %19 {strides = array<i32>} : memref<8x32xf32, #tpu.memory_space<vmem>>, vector<8x32xf32>,
    } else {
    }
    %c0 = arith.constant 0 : index
    %c0_1 = arith.constant 0 : index
    %3 = vector.load %arg2[%c0, %c0_1] : memref<8x32xf32, #tpu.memory_space<vmem>>, vector<8x32xf32>
    %c0_2 = arith.constant 0 : index
    %c0_3 = arith.constant 0 : index
    %4 = vector.load %arg3[%c0_2, %c0_3] : memref<32x64xf32, #tpu.memory_space<vmem>>, vector<32x64xf32>
    %cst = arith.constant dense<0.000000e+00> : vector<8x64xf32>
    %5 = tpu.matmul %3, %4, %cst {dimension_numbers = #tpu.dot_dimension_numbers<[1], [0], [0], [1], [0, 0, 1, 1], [], []>} : vector<8x32xf32>, vector<32x64xf32>, vector<8x64xf32> -> vector<8x64xf32>
    %c0_4 = arith.constant 0 : index
    %c0_5 = arith.constant 0 : index
    %6 = vector.load %arg4[%c0_4, %c0_5] : memref<1x64xf32, #tpu.memory_space<vmem>>, vector<1x64xf32>
    %7 = vector.broadcast %6 : vector<1x64xf32> to vector<8x64xf32>
    %8 = arith.addf %5, %7 : vector<8x64xf32>
    %cst_6 = arith.constant 0.000000e+00 : f32
    %9 = vector.broadcast %cst_6 : f32 to vector<8x64xf32>
    %10 = arith.maximumf %8, %9 : vector<8x64xf32>
    %c0_7 = arith.constant 0 : index
    %c0_8 = arith.constant 0 : index
    %11 = vector.load %arg8[%c0_7, %c0_8] : memref<8x32xf32, #tpu.memory_space<vmem>>, vector<8x32xf32>
    %c0_9 = arith.constant 0 : index
    %c0_10 = arith.constant 0 : index
    %12 = vector.load %arg5[%c0_9, %c0_10] : memref<64x32xf32, #tpu.memory_space<vmem>>, vector<64x32xf32>
    %cst_11 = arith.constant dense<0.000000e+00> : vector<8x32xf32>
    %13 = tpu.matmul %10, %12, %cst_11 {dimension_numbers = #tpu.dot_dimension_numbers<[1], [0], [0], [1], [0, 0, 1, 1], [], []>} : vector<8x64xf32>, vector<64x32xf32>, vector<8x32xf32> -> vector<8x32xf32>
    %14 = arith.addf %11, %13 : vector<8x32xf32>
    %c0_12 = arith.constant 0 : index
    %c0_13 = arith.constant 0 : index
    %15 = vector.load %arg8[%c0_12, %c0_13] : memref<8x32xf32, #tpu.memory_space<vmem>>, vector<8x32xf32>
    tpu.vector_store %arg8[%c0_12, %c0_13], %14 {strides = array<i32>} : memref<8x32xf32, #tpu.memory_space<vmem>>, vector<8x32xf32>,
    %c0_i32_14 = arith.constant 0 : i32
    %16 = arith.cmpi eq, %arg1, %c0_i32_14 : i32
    %17 = arith.extui %16 : i1 to i32
    %c0_i32_15 = arith.constant 0 : i32
    %18 = arith.cmpi ne, %17, %c0_i32_15 : i32
    scf.if %18 {
      %c0_16 = arith.constant 0 : index
      %c0_17 = arith.constant 0 : index
      %19 = vector.load %arg8[%c0_16, %c0_17] : memref<8x32xf32, #tpu.memory_space<vmem>>, vector<8x32xf32>
      %c0_18 = arith.constant 0 : index
      %c0_19 = arith.constant 0 : index
      %20 = vector.load %arg6[%c0_18, %c0_19] : memref<1x32xf32, #tpu.memory_space<vmem>>, vector<1x32xf32>
      %21 = vector.broadcast %20 : vector<1x32xf32> to vector<8x32xf32>
      %22 = arith.addf %19, %21 : vector<8x32xf32>
      %23 = arith.addf %22, %3 : vector<8x32xf32>
      %c0_20 = arith.constant 0 : index
      %c0_21 = arith.constant 0 : index
      %24 = vector.load %arg7[%c0_20, %c0_21] : memref<8x32xf32, #tpu.memory_space<vmem>>, vector<8x32xf32>
      tpu.vector_store %arg7[%c0_20, %c0_21], %23 {strides = array<i32>} : memref<8x32xf32, #tpu.memory_space<vmem>>, vector<8x32xf32>,
    } else {
    }
    return
  }
  func.func @transform_0(%arg0: i32, %arg1: i32) -> (i32, i32) {
    %c0_i32 = arith.constant 0 : i32
    %c0_i32_0 = arith.constant 0 : i32
    return %arg0, %c0_i32 : i32, i32
  }
  func.func @transform_1(%arg0: i32, %arg1: i32) -> (i32, i32) {
    %c0_i32 = arith.constant 0 : i32
    %c0_i32_0 = arith.constant 0 : i32
    return %c0_i32, %arg1 : i32, i32
  }
  func.func @transform_2(%arg0: i32, %arg1: i32) -> (i32, i32) {
    %c0_i32 = arith.constant 0 : i32
    %c0_i32_0 = arith.constant 0 : i32
    return %c0_i32, %arg1 : i32, i32
  }
  func.func @transform_3(%arg0: i32, %arg1: i32) -> (i32, i32) {
    %c0_i32 = arith.constant 0 : i32
    %c0_i32_0 = arith.constant 0 : i32
    return %arg1, %c0_i32 : i32, i32
  }
  func.func @transform_4(%arg0: i32, %arg1: i32) -> (i32, i32) {
    %c0_i32 = arith.constant 0 : i32
    %c0_i32_0 = arith.constant 0 : i32
    %c0_i32_1 = arith.constant 0 : i32
    return %c0_i32, %c0_i32_0 : i32, i32
  }
  func.func @transform_5(%arg0: i32, %arg1: i32) -> (i32, i32) {
    %c0_i32 = arith.constant 0 : i32
    %c0_i32_0 = arith.constant 0 : i32
    return %arg0, %c0_i32 : i32, i32
  }
}

module attributes {stable_mosaic.version = 11 : i64} {
  func.func @_qkv_proj_kernel(%arg0: i32, %arg1: memref<8x32xf32, #tpu.memory_space<vmem>>, %arg2: memref<32x32xf32, #tpu.memory_space<vmem>>, %arg3: memref<32x32xf32, #tpu.memory_space<vmem>>, %arg4: memref<32x32xf32, #tpu.memory_space<vmem>>, %arg5: memref<8x32xf32, #tpu.memory_space<vmem>>, %arg6: memref<8x32xf32, #tpu.memory_space<vmem>>, %arg7: memref<8x32xf32, #tpu.memory_space<vmem>>) attributes {dimension_semantics = [#tpu.dimension_semantics<parallel>], iteration_bounds = array<i64: 2>, scalar_prefetch = 0 : i64, scratch_operands = 0 : i64, tpu.core_type = #tpu.core_type<tc>, window_params = [{transform_indices = @transform_0, window_bounds = array<i64: 8, 32>}, {pipeline_mode = #tpu.pipeline_mode<synchronous>, transform_indices = @transform_1, window_bounds = array<i64: 32, 32>}, {pipeline_mode = #tpu.pipeline_mode<synchronous>, transform_indices = @transform_2, window_bounds = array<i64: 32, 32>}, {pipeline_mode = #tpu.pipeline_mode<synchronous>, transform_indices = @transform_3, window_bounds = array<i64: 32, 32>}, {transform_indices = @transform_4, window_bounds = array<i64: 8, 32>}, {transform_indices = @transform_5, window_bounds = array<i64: 8, 32>}, {transform_indices = @transform_6, window_bounds = array<i64: 8, 32>}]} {
    %c0 = arith.constant 0 : index
    %c0_0 = arith.constant 0 : index
    %0 = vector.load %arg1[%c0, %c0_0] : memref<8x32xf32, #tpu.memory_space<vmem>>, vector<8x32xf32>
    %c0_1 = arith.constant 0 : index
    %c0_2 = arith.constant 0 : index
    %1 = vector.load %arg2[%c0_1, %c0_2] : memref<32x32xf32, #tpu.memory_space<vmem>>, vector<32x32xf32>
    %cst = arith.constant dense<0.000000e+00> : vector<8x32xf32>
    %2 = tpu.matmul %0, %1, %cst {dimension_numbers = #tpu.dot_dimension_numbers<[1], [0], [0], [1], [0, 0, 1, 1], [], []>} : vector<8x32xf32>, vector<32x32xf32>, vector<8x32xf32> -> vector<8x32xf32>
    %c0_3 = arith.constant 0 : index
    %c0_4 = arith.constant 0 : index
    %3 = vector.load %arg5[%c0_3, %c0_4] : memref<8x32xf32, #tpu.memory_space<vmem>>, vector<8x32xf32>
    tpu.vector_store %arg5[%c0_3, %c0_4], %2 {strides = array<i32>} : memref<8x32xf32, #tpu.memory_space<vmem>>, vector<8x32xf32>,
    %c0_5 = arith.constant 0 : index
    %c0_6 = arith.constant 0 : index
    %4 = vector.load %arg3[%c0_5, %c0_6] : memref<32x32xf32, #tpu.memory_space<vmem>>, vector<32x32xf32>
    %cst_7 = arith.constant dense<0.000000e+00> : vector<8x32xf32>
    %5 = tpu.matmul %0, %4, %cst_7 {dimension_numbers = #tpu.dot_dimension_numbers<[1], [0], [0], [1], [0, 0, 1, 1], [], []>} : vector<8x32xf32>, vector<32x32xf32>, vector<8x32xf32> -> vector<8x32xf32>
    %c0_8 = arith.constant 0 : index
    %c0_9 = arith.constant 0 : index
    %6 = vector.load %arg6[%c0_8, %c0_9] : memref<8x32xf32, #tpu.memory_space<vmem>>, vector<8x32xf32>
    tpu.vector_store %arg6[%c0_8, %c0_9], %5 {strides = array<i32>} : memref<8x32xf32, #tpu.memory_space<vmem>>, vector<8x32xf32>,
    %c0_10 = arith.constant 0 : index
    %c0_11 = arith.constant 0 : index
    %7 = vector.load %arg4[%c0_10, %c0_11] : memref<32x32xf32, #tpu.memory_space<vmem>>, vector<32x32xf32>
    %cst_12 = arith.constant dense<0.000000e+00> : vector<8x32xf32>
    %8 = tpu.matmul %0, %7, %cst_12 {dimension_numbers = #tpu.dot_dimension_numbers<[1], [0], [0], [1], [0, 0, 1, 1], [], []>} : vector<8x32xf32>, vector<32x32xf32>, vector<8x32xf32> -> vector<8x32xf32>
    %c0_13 = arith.constant 0 : index
    %c0_14 = arith.constant 0 : index
    %9 = vector.load %arg7[%c0_13, %c0_14] : memref<8x32xf32, #tpu.memory_space<vmem>>, vector<8x32xf32>
    tpu.vector_store %arg7[%c0_13, %c0_14], %8 {strides = array<i32>} : memref<8x32xf32, #tpu.memory_space<vmem>>, vector<8x32xf32>,
    return
  }
  func.func @transform_0(%arg0: i32) -> (i32, i32) {
    %c0_i32 = arith.constant 0 : i32
    %c0_i32_0 = arith.constant 0 : i32
    return %arg0, %c0_i32 : i32, i32
  }
  func.func @transform_1(%arg0: i32) -> (i32, i32) {
    %c0_i32 = arith.constant 0 : i32
    %c0_i32_0 = arith.constant 0 : i32
    %c0_i32_1 = arith.constant 0 : i32
    return %c0_i32, %c0_i32_0 : i32, i32
  }
  func.func @transform_2(%arg0: i32) -> (i32, i32) {
    %c0_i32 = arith.constant 0 : i32
    %c0_i32_0 = arith.constant 0 : i32
    %c0_i32_1 = arith.constant 0 : i32
    return %c0_i32, %c0_i32_0 : i32, i32
  }
  func.func @transform_3(%arg0: i32) -> (i32, i32) {
    %c0_i32 = arith.constant 0 : i32
    %c0_i32_0 = arith.constant 0 : i32
    %c0_i32_1 = arith.constant 0 : i32
    return %c0_i32, %c0_i32_0 : i32, i32
  }
  func.func @transform_4(%arg0: i32) -> (i32, i32) {
    %c0_i32 = arith.constant 0 : i32
    %c0_i32_0 = arith.constant 0 : i32
    return %arg0, %c0_i32 : i32, i32
  }
  func.func @transform_5(%arg0: i32) -> (i32, i32) {
    %c0_i32 = arith.constant 0 : i32
    %c0_i32_0 = arith.constant 0 : i32
    return %arg0, %c0_i32 : i32, i32
  }
  func.func @transform_6(%arg0: i32) -> (i32, i32) {
    %c0_i32 = arith.constant 0 : i32
    %c0_i32_0 = arith.constant 0 : i32
    return %arg0, %c0_i32 : i32, i32
  }
}

module attributes {stable_mosaic.version = 11 : i64} {
  func.func @_ffn_kernel(%arg0: i32, %arg1: i32, %arg2: memref<8x32xf32, #tpu.memory_space<vmem>>, %arg3: memref<32x64xf32, #tpu.memory_space<vmem>>, %arg4: memref<1x64xf32, #tpu.memory_space<vmem>>, %arg5: memref<64x32xf32, #tpu.memory_space<vmem>>, %arg6: memref<1x32xf32, #tpu.memory_space<vmem>>, %arg7: memref<8x32xf32, #tpu.memory_space<vmem>>, %arg8: memref<8x32xf32, #tpu.memory_space<vmem>>) attributes {dimension_semantics = [#tpu.dimension_semantics<parallel>, #tpu.dimension_semantics<arbitrary>], iteration_bounds = array<i64: 2, 1>, scalar_prefetch = 0 : i64, scratch_operands = 1 : i64, tpu.core_type = #tpu.core_type<tc>, window_params = [{transform_indices = @transform_0, window_bounds = array<i64: 8, 32>}, {transform_indices = @transform_1, window_bounds = array<i64: 32, 64>}, {transform_indices = @transform_2, window_bounds = array<i64: 1, 64>}, {transform_indices = @transform_3, window_bounds = array<i64: 64, 32>}, {pipeline_mode = #tpu.pipeline_mode<synchronous>, transform_indices = @transform_4, window_bounds = array<i64: 1, 32>}, {transform_indices = @transform_5, window_bounds = array<i64: 8, 32>}]} {
    %c0_i32 = arith.constant 0 : i32
    %0 = arith.cmpi eq, %arg1, %c0_i32 : i32
    %1 = arith.extui %0 : i1 to i32
    %c0_i32_0 = arith.constant 0 : i32
    %2 = arith.cmpi ne, %1, %c0_i32_0 : i32
    scf.if %2 {
      %cst_16 = arith.constant 0.000000e+00 : f32
      %19 = vector.broadcast %cst_16 : f32 to vector<8x32xf32>
      %c0_17 = arith.constant 0 : index
      %c0_18 = arith.constant 0 : index
      %20 = vector.load %arg8[%c0_17, %c0_18] : memref<8x32xf32, #tpu.memory_space<vmem>>, vector<8x32xf32>
      tpu.vector_store %arg8[%c0_17, %c0_18], %19 {strides = array<i32>} : memref<8x32xf32, #tpu.memory_space<vmem>>, vector<8x32xf32>,
    } else {
    }
    %c0 = arith.constant 0 : index
    %c0_1 = arith.constant 0 : index
    %3 = vector.load %arg2[%c0, %c0_1] : memref<8x32xf32, #tpu.memory_space<vmem>>, vector<8x32xf32>
    %c0_2 = arith.constant 0 : index
    %c0_3 = arith.constant 0 : index
    %4 = vector.load %arg3[%c0_2, %c0_3] : memref<32x64xf32, #tpu.memory_space<vmem>>, vector<32x64xf32>
    %cst = arith.constant dense<0.000000e+00> : vector<8x64xf32>
    %5 = tpu.matmul %3, %4, %cst {dimension_numbers = #tpu.dot_dimension_numbers<[1], [0], [0], [1], [0, 0, 1, 1], [], []>} : vector<8x32xf32>, vector<32x64xf32>, vector<8x64xf32> -> vector<8x64xf32>
    %c0_4 = arith.constant 0 : index
    %c0_5 = arith.constant 0 : index
    %6 = vector.load %arg4[%c0_4, %c0_5] : memref<1x64xf32, #tpu.memory_space<vmem>>, vector<1x64xf32>
    %7 = vector.broadcast %6 : vector<1x64xf32> to vector<8x64xf32>
    %8 = arith.addf %5, %7 : vector<8x64xf32>
    %cst_6 = arith.constant 0.000000e+00 : f32
    %9 = vector.broadcast %cst_6 : f32 to vector<8x64xf32>
    %10 = arith.maximumf %8, %9 : vector<8x64xf32>
    %c0_7 = arith.constant 0 : index
    %c0_8 = arith.constant 0 : index
    %11 = vector.load %arg8[%c0_7, %c0_8] : memref<8x32xf32, #tpu.memory_space<vmem>>, vector<8x32xf32>
    %c0_9 = arith.constant 0 : index
    %c0_10 = arith.constant 0 : index
    %12 = vector.load %arg5[%c0_9, %c0_10] : memref<64x32xf32, #tpu.memory_space<vmem>>, vector<64x32xf32>
    %cst_11 = arith.constant dense<0.000000e+00> : vector<8x32xf32>
    %13 = tpu.matmul %10, %12, %cst_11 {dimension_numbers = #tpu.dot_dimension_numbers<[1], [0], [0], [1], [0, 0, 1, 1], [], []>} : vector<8x64xf32>, vector<64x32xf32>, vector<8x32xf32> -> vector<8x32xf32>
    %14 = arith.addf %11, %13 : vector<8x32xf32>
    %c0_12 = arith.constant 0 : index
    %c0_13 = arith.constant 0 : index
    %15 = vector.load %arg8[%c0_12, %c0_13] : memref<8x32xf32, #tpu.memory_space<vmem>>, vector<8x32xf32>
    tpu.vector_store %arg8[%c0_12, %c0_13], %14 {strides = array<i32>} : memref<8x32xf32, #tpu.memory_space<vmem>>, vector<8x32xf32>,
    %c0_i32_14 = arith.constant 0 : i32
    %16 = arith.cmpi eq, %arg1, %c0_i32_14 : i32
    %17 = arith.extui %16 : i1 to i32
    %c0_i32_15 = arith.constant 0 : i32
    %18 = arith.cmpi ne, %17, %c0_i32_15 : i32
    scf.if %18 {
      %c0_16 = arith.constant 0 : index
      %c0_17 = arith.constant 0 : index
      %19 = vector.load %arg8[%c0_16, %c0_17] : memref<8x32xf32, #tpu.memory_space<vmem>>, vector<8x32xf32>
      %c0_18 = arith.constant 0 : index
      %c0_19 = arith.constant 0 : index
      %20 = vector.load %arg6[%c0_18, %c0_19] : memref<1x32xf32, #tpu.memory_space<vmem>>, vector<1x32xf32>
      %21 = vector.broadcast %20 : vector<1x32xf32> to vector<8x32xf32>
      %22 = arith.addf %19, %21 : vector<8x32xf32>
      %23 = arith.addf %22, %3 : vector<8x32xf32>
      %c0_20 = arith.constant 0 : index
      %c0_21 = arith.constant 0 : index
      %24 = vector.load %arg7[%c0_20, %c0_21] : memref<8x32xf32, #tpu.memory_space<vmem>>, vector<8x32xf32>
      tpu.vector_store %arg7[%c0_20, %c0_21], %23 {strides = array<i32>} : memref<8x32xf32, #tpu.memory_space<vmem>>, vector<8x32xf32>,
    } else {
    }
    return
  }
  func.func @transform_0(%arg0: i32, %arg1: i32) -> (i32, i32) {
    %c0_i32 = arith.constant 0 : i32
    %c0_i32_0 = arith.constant 0 : i32
    return %arg0, %c0_i32 : i32, i32
  }
  func.func @transform_1(%arg0: i32, %arg1: i32) -> (i32, i32) {
    %c0_i32 = arith.constant 0 : i32
    %c0_i32_0 = arith.constant 0 : i32
    return %c0_i32, %arg1 : i32, i32
  }
  func.func @transform_2(%arg0: i32, %arg1: i32) -> (i32, i32) {
    %c0_i32 = arith.constant 0 : i32
    %c0_i32_0 = arith.constant 0 : i32
    return %c0_i32, %arg1 : i32, i32
  }
  func.func @transform_3(%arg0: i32, %arg1: i32) -> (i32, i32) {
    %c0_i32 = arith.constant 0 : i32
    %c0_i32_0 = arith.constant 0 : i32
    return %arg1, %c0_i32 : i32, i32
  }
  func.func @transform_4(%arg0: i32, %arg1: i32) -> (i32, i32) {
    %c0_i32 = arith.constant 0 : i32
    %c0_i32_0 = arith.constant 0 : i32
    %c0_i32_1 = arith.constant 0 : i32
    return %c0_i32, %c0_i32_0 : i32, i32
  }
  func.func @transform_5(%arg0: i32, %arg1: i32) -> (i32, i32) {
    %c0_i32 = arith.constant 0 : i32
    %c0_i32_0 = arith.constant 0 : i32
    return %arg0, %c0_i32 : i32, i32
  }
}

</mosaic_0001>

<bundles_post_ra>
// kernel: encoder_forward.10
= control target key start
LH: loop header
LB: loop body
LE: loop exit
PB: predicated region body
PF: predicated region fallthrough
CT: control target
= control target key end

     0   :  { %s404_s12 = smov 0   ;;  %s436_s0 = inlined_call_operand.vmem [shape: f32[16,32], index: 0, kind: input, shape index: {}]   ;;  %s437_s1 = inlined_call_operand.vmem [shape: f32[32,32], index: 1, kind: input, shape index: {}]   ;;  %s438_s2 = inlined_call_operand.vmem [shape: f32[16,32], index: 2, kind: input, shape index: {}]   ;;  %s439_s3 = inlined_call_operand.vmem [shape: f32[16,32], index: 3, kind: output, shape index: {}]  }
   0x1 LB: > { %s329_s13 = sadd.s32 4294967295, %s379_s12   ;;  %p333_p0 = scmp.ge.s32.totalorder %s379_s12, 1  ;;  %s379_s12 = sphi %s404_s12, %s13_s12  }
   0x2   : > { %p145_p1 = scmp.lt.s32.totalorder %s379_s12, 3 }
   0x4   : > { %p146_p2 = pnand %p333_p0, %p145_p1 }
   0x5   : > { %v184_v0 = vld [vmem:[%s437_s1] sm:$0xff] (!%p146_p2)  ;;  %v185_v1 = vld [vmem:[%s437_s1 + $0x8] sm:$0xff] (!%p146_p2)  ;;  %v186_v2 = vld [vmem:[%s437_s1 + $0x10] sm:$0xff] (!%p146_p2)  ;;  %v381_v3 = vmov (!%p146_p2), 0.0|0.0   ;;  %vm382_vm0 = vmmov (!%p146_p2), 0   ;;  %v383_v6 = vmov (!%p146_p2), 0.0  }
   0x6   : > { %149 = sbr.rel (%p146_p2) target bundleno = 232 (0xe8), region = 32  ;;  %356 = vmatprep.subr.bf16.mxu0 (!%p146_p2), %v381_v3  ;;  %v357_v4 = vpack.c.bf16 (!%p146_p2), %v185_v1, %v184_v0  ;;  %v187_v5 = vld [vmem:[%s437_s1 + $0x18] sm:$0xff] (!%p146_p2)  ;;  %353 = vmatprep.mubr.msk.f32.mxu0 (!%p146_p2), %vm382_vm0, %v383_v6  ;;  %p171_p3 = scmp.lt.s32.totalorder (!%p146_p2), %s329_s13, 1  ;;  %vm189_vm1 = vcmask (!%p146_p2), 261120  }
   0x7   : > { %v360_v7 = vpack.c.bf16 (!%p146_p2), %v187_v5, %v186_v2 }
   0x8   : > { %358 = vmatpush3.bf16.msra.mxu0 (!%p146_p2), %v357_v4 }
   0x9   : > { %359 = vmatprep.subr.bf16.mxu0 (!%p146_p2), %v381_v3 }
   0xc   : > { %361 = vmatpush3.bf16.msra.mxu0 (!%p146_p2), %v360_v7 }
   0xd   : > { %s441_s13 = smov (!%p171_p3, %s329_s13), 1 }
   0xe   : > { %s334_s22 = sshll.u32 %s441_s13, 3 }
   0xf   : > { %s174_s25 = scalar_lea.vmem %s436_s0, %s334_s22  ;;  %s178_s28 = scalar_lea.vmem %s438_s2, %s334_s22 }
  0x10   : > { %v183_v8 = vld [vmem:[%s174_s25] sm:$0xff]  ;;  %s182_s4 = scalar_lea.vmem %s439_s3, %s334_s22 }
  0x11   : > { %354 = vmatmul.mubr.msk.f32.vlgmr.msra.gmra.mrb[0].mxu0 %vm189_vm1, %v183_v8  ;;  %v188_v9 = vld [vmem:[%s178_s28] sm:$0xff] }
  0xe4   : > { %v259_v10 = vpop.f32.mrb[0].mxu0 }
  0xe5   : > { %v260_v11 = vadd.f32 %v259_v10, %v188_v9  ;;  %v355_v12 = vpop.f32.mrb[1].mxu0 }
  0xe7   : > { %263 = vst.msk [vmem:[%s182_s4] sm:$0xff] %vm189_vm1, %v260_v11 }
  0xe8 PF: > { %s13_s12 = sadd.s32 1, %s379_s12  }
  0xe9   : > { %p10_p4 = scmp.ge.s32.totalorder %s13_s12, 4  }
  0xeb   :  { %12 = sbr.rel (!%p10_p4) target bundleno = 1 (0x1), region = 65 }

// kernel: encoder_forward.8
= control target key start
LH: loop header
LB: loop body
LE: loop exit
PB: predicated region body
PF: predicated region fallthrough
CT: control target
= control target key end

     0   :  { %12 = vsyncpa [#allocation3], 0  ;;  %s1109_s0 = inlined_call_operand.vmem [shape: f32[16,32], index: 0, kind: input, shape index: {}]   ;;  %s1110_s1 = inlined_call_operand.hbm [shape: f32[32,32], index: 1, kind: input, shape index: {}]   ;;  %s1111_s2 = inlined_call_operand.hbm [shape: f32[32,32], index: 2, kind: input, shape index: {}]   ;;  %s1112_s3 = inlined_call_operand.hbm [shape: f32[32,32], index: 3, kind: input, shape index: {}]   ;;  %s1113_s4 = inlined_call_operand.vmem [shape: f32[16,32], index: 4, kind: output, shape index: {0}]   ;;  %s1114_s5 = inlined_call_operand.vmem [shape: f32[16,32], index: 5, kind: output, shape index: {1}]   ;;  %s1115_s6 = inlined_call_operand.vmem [shape: f32[16,32], index: 6, kind: output, shape index: {2}]  }
   0x1   :  { %13 = vsyncpa [#allocation5], 0  ;;  %s961_s21 = smov 0  }
   0x2 LB: > { %s967_s22 = sadd.s32 4294967295, %s916_s21   ;;  %p690_p0 = scmp.ge.s32.totalorder %s916_s21, 1  ;;  %s916_s21 = sphi %s961_s21, %s19_s21  }
   0x3   : > { %p191_p1 = scmp.lt.s32.totalorder %s916_s21, 3  ;;  %p1116_p2 = scmp.eq.s32.totalorder %s967_s22, 0 }
   0x4   : > { %s918_s24 = smov [#allocation4]   ;;  %s919_s26 = smov [#allocation2]  }
   0x5   : > { %p972_p3 = pnand %p690_p0, %p191_p1  ;;  %s216_s25 = sshll.u32 %s918_s24, 4  ;;  %s217_s25 = int_to_ptr.vmem [resolvable:$true] %s216_s25 }
   0x6   : > { %s203_s27 = sshll.u32 %s919_s26, 4  ;;  %s920_s29 = smov [#allocation6]   ;;  %s984_s27 = int_to_ptr.vmem [resolvable:$true] %s203_s27 }
   0x7   : > { %s1118_s23 = scalar_select %p972_p3, 1, 0 }
   0x8   : > { %p786_p4 = pneg %p972_p3  ;;  %s229_s30 = sshll.u32 %s920_s29, 4  ;;  %s986_s30 = int_to_ptr.vmem [resolvable:$true] %s229_s30 }
   0x9   : > { %s818_s9 = scalar_lea.hbm %s1111_s2, 512 }
   0xa   : > { %p980_p5 = pnand %p1116_p2, %p786_p4  ;;  %p819_p6 = scmp.ne.s32.totalorder %s1111_s2, %s818_s9 }
   0xb   : > { %p825_p10 = scmp.lt.u32.totalorder %s818_s9, %s1111_s2 }
   0xc   : > { %p996_p7 = pneg %p980_p5 }
   0xe   : > { %p821_p8 = pnand %p996_p7, %p819_p6 }
  0x10   : > { %p822_p9 = pneg %p821_p8 }
  0x12   : > { %p827_p11 = pnand %p825_p10, %p822_p9 }
  0x14   : > { %830 = shalt.err (!%p827_p11)
}
  0x15   : > { %s831_s15 = scalar_lea.vmem %s217_s25, 512  ;;  %p839_p1 = scmp.lt.s32.totalorder %s217_s25, %s217_s25 }
  0x16   : > { %p832_p12 = scmp.ne.s32.totalorder %s217_s25, %s831_s15  ;;  %p840_p4 = scmp.lt.s32.totalorder %s831_s15, %s831_s15 }
  0x18   : > { %p834_p13 = pnand %p832_p12, %p996_p7  ;;  %p841_p2 = por %p840_p4, %p839_p1 }
  0x1a   : > { %p835_p0 = pneg %p834_p13 }
  0x1c   : > { %p842_p3 = pnand %p841_p2, %p835_p0 }
  0x1e   : > { %845 = shalt.err (!%p842_p3)
}
  0x1f   : > { %s921_s16 = smov 128   ;;  %s922_s17 = smov 8  }
  0x20   : > { %792 = dma.hbm_to_vmem [thread:$0]  (!%p980_p5), %s1111_s2, 512, %s217_s25, [#allocation5], %s921_s16, %s921_s16, %s922_s17  }
  0x21   : > { %s846_s26 = scalar_lea.hbm %s1110_s1, 512 }
  0x22   : > { %p847_p2 = scmp.ne.s32.totalorder %s1110_s1, %s846_s26  ;;  %p853_p8 = scmp.lt.u32.totalorder %s846_s26, %s1110_s1 }
  0x24   : > { %p849_p3 = pnand %p847_p2, %p996_p7 }
  0x26   : > { %p850_p6 = pneg %p849_p3 }
  0x28   : > { %p855_p9 = pnand %p853_p8, %p850_p6 }
  0x2a   : > { %858 = shalt.err (!%p855_p9)
}
  0x2b   : > { %s859_s25 = scalar_lea.vmem %s984_s27, 512  ;;  %p867_p13 = scmp.lt.s32.totalorder %s984_s27, %s984_s27 }
  0x2c   : > { %p860_p10 = scmp.ne.s32.totalorder %s984_s27, %s859_s25  ;;  %p868_p0 = scmp.lt.s32.totalorder %s859_s25, %s859_s25 }
  0x2e   : > { %p862_p11 = pnand %p860_p10, %p996_p7  ;;  %p869_p1 = por %p868_p0, %p867_p13 }
  0x30   : > { %p863_p12 = pneg %p862_p11 }
  0x32   : > { %p870_p4 = pnand %p869_p1, %p863_p12 }
  0x34   : > { %873 = shalt.err (!%p870_p4)
}
  0x35   : > { %789 = dma.hbm_to_vmem [thread:$0]  (!%p980_p5), %s1110_s1, 512, %s984_s27, [#allocation3], %s921_s16, %s921_s16, %s922_s17  }
  0x36   : > { %s874_s15 = scalar_lea.hbm %s1112_s3, 512 }
  0x37   : > { %p875_p2 = scmp.ne.s32.totalorder %s1112_s3, %s874_s15  ;;  %p881_p8 = scmp.lt.u32.totalorder %s874_s15, %s1112_s3 }
  0x39   : > { %p877_p3 = pnand %p875_p2, %p996_p7 }
  0x3b   : > { %p878_p6 = pneg %p877_p3 }
  0x3d   : > { %p883_p9 = pnand %p881_p8, %p878_p6 }
  0x3f   : > { %886 = shalt.err (!%p883_p9)
}
  0x40   : > { %s887_s27 = scalar_lea.vmem %s986_s30, 512  ;;  %p895_p13 = scmp.lt.s32.totalorder %s986_s30, %s986_s30 }
  0x41   : > { %p888_p10 = scmp.ne.s32.totalorder %s986_s30, %s887_s27  ;;  %p896_p0 = scmp.lt.s32.totalorder %s887_s27, %s887_s27 }
  0x43   : > { %p890_p11 = pnand %p888_p10, %p996_p7  ;;  %p897_p1 = por %p896_p0, %p895_p13 }
  0x45   : > { %p891_p12 = pneg %p890_p11 }
  0x47   : > { %p898_p4 = pnand %p897_p1, %p891_p12 }
  0x49   : > { %901 = shalt.err (!%p898_p4)
}
  0x4a   : > { %795 = dma.hbm_to_vmem [thread:$0]  (!%p980_p5), %s1112_s3, 512, %s986_s30, [#allocation5], %s921_s16, %s921_s16, %s922_s17  }
  0x4b   : > { %p1121_p2 = scmp.ne.s32.totalorder %s1118_s23, 0 }
  0x4c   : > { %p1122_p7 = scmp.eq.s32.totalorder (!%p1121_p2), %s967_s22, 0 }
  0x4d   : > { %252 = sbr.rel (%p1121_p2) target bundleno = 321 (0x141), region = 36 }
  0x54   : > { %907 = dma.done.wait (%p1122_p7), [#allocation3], 512   ;;  %p1123_p3 = pmov %p1122_p7 }
  0x56   : > { %909 = vsyncadd (%p1123_p3), [#allocation3], 4294966784  ;;  %p1124_p6 = pmov %p1123_p3 }
  0x57   : > { %p1125_p8 = pmov %p1123_p3 }
  0x58   : > { %911 = dma.done.wait (%p1124_p6), [#allocation5], 1024  }
  0x59   : > { %913 = vsyncadd (%p1125_p8), [#allocation5], 4294966272  ;;  %p296_p9 = scmp.lt.s32.totalorder %s967_s22, 1  ;;  %v923_v0 = vmov 0.0|0.0   ;;  %vm924_vm0 = vmmov 0   ;;  %v925_v1 = vmov 0.0  }
  0x5a   : > { %756 = vmatprep.subr.bf16.mxu0 %v923_v0  ;;  %731 = vmatprep.mubr.msk.f32.mxu0 %vm924_vm0, %v925_v1  ;;  %v313_v2 = vld [vmem:[#allocation2] sm:$0xff]  ;;  %v314_v3 = vld [vmem:[#allocation2 + $0x8] sm:$0xff]  ;;  %v315_v4 = vld [vmem:[#allocation2 + $0x10] sm:$0xff]  ;;  %vm317_vm1 = vcmask 261120  }
  0x5b   : > { %762 = vmatprep.subr.bf16.mxu1 %v923_v0  ;;  %742 = vmatprep.mubr.msk.f32.mxu1 %vm924_vm0, %v925_v1  ;;  %s1127_s22 = smov (!%p296_p9, %s967_s22), 1  ;;  %v757_v5 = vpack.c.bf16 %v314_v3, %v313_v2  ;;  %v316_v6 = vld [vmem:[#allocation2 + $0x18] sm:$0xff]  ;;  %v392_v7 = vld [vmem:[#allocation4] sm:$0xff]  ;;  %v393_v8 = vld [vmem:[#allocation4 + $0x8] sm:$0xff] }
  0x5c   : > { %s1081_s23 = sshll.u32 %s1127_s22, 3  ;;  %v760_v9 = vpack.c.bf16 %v316_v6, %v315_v4  ;;  %v763_v10 = vpack.c.bf16 %v393_v8, %v392_v7  ;;  %v394_v11 = vld [vmem:[#allocation4 + $0x10] sm:$0xff]  ;;  %v395_v12 = vld [vmem:[#allocation4 + $0x18] sm:$0xff]  ;;  %v467_v13 = vld [vmem:[#allocation6] sm:$0xff] }
  0x5d   : > { %758 = vmatpush3.bf16.msra.mxu0 %v757_v5  ;;  %s299_s12 = scalar_lea.vmem %s1109_s0, %s1081_s23  ;;  %v468_v14 = vld [vmem:[#allocation6 + $0x8] sm:$0xff]  ;;  %v766_v15 = vpack.c.bf16 %v395_v12, %v394_v11  ;;  %v469_v18 = vld [vmem:[#allocation6 + $0x10] sm:$0xff]  ;;  %v470_v19 = vld [vmem:[#allocation6 + $0x18] sm:$0xff]  ;;  %s303_s17 = scalar_lea.vmem %s1113_s4, %s1081_s23 }
  0x5e   : > { %759 = vmatprep.subr.bf16.mxu0 %v923_v0  ;;  %764 = vmatpush3.bf16.msra.mxu1 %v763_v10  ;;  %v312_v16 = vld [vmem:[%s299_s12] sm:$0xff]  ;;  %v769_v17 = vpack.c.bf16 %v468_v14, %v467_v13  ;;  %v772_v20 = vpack.c.bf16 %v470_v19, %v469_v18  ;;  %s307_s9 = scalar_lea.vmem %s1114_s5, %s1081_s23  ;;  %s311_s11 = scalar_lea.vmem %s1115_s6, %s1081_s23 }
  0x5f   : > { %765 = vmatprep.subr.bf16.mxu1 %v923_v0 }
  0x61   : > { %761 = vmatpush3.bf16.msra.mxu0 %v760_v9 }
  0x62   : > { %768 = vmatprep.subr.bf16.mxu0 %v923_v0  ;;  %767 = vmatpush3.bf16.msra.mxu1 %v766_v15 }
  0x64   : > { %732 = vmatmul.mubr.msk.f32.vlgmr.msra.gmra.mrb[0].mxu0 %vm317_vm1, %v312_v16 }
  0x65   : > { %770 = vmatpush3.bf16.msra.mxu0 %v769_v17  ;;  %753 = vmatprep.mubr.msk.f32.mxu0 %vm924_vm0, %v925_v1 }
  0x66   : > { %771 = vmatprep.subr.bf16.mxu0 %v923_v0  ;;  %743 = vmatmul.mubr.msk.f32.vlgmr.msra.gmra.mrb[0].mxu1 %vm317_vm1, %v312_v16 }
  0x69   : > { %773 = vmatpush3.bf16.msra.mxu0 %v772_v20 }
  0x6c   : > { %754 = vmatmul.mubr.msk.f32.vlgmr.msra.gmra.mrb[2].mxu0 %vm317_vm1, %v312_v16 }
 0x137   : > { %v387_v21 = vpop.f32.mrb[0].mxu0 }
 0x138   : > { %391 = vst.msk [vmem:[%s303_s17] sm:$0xff] %vm317_vm1, %v387_v21  ;;  %v733_v22 = vpop.f32.mrb[1].mxu0 }
 0x139   : > { %v462_v23 = vpop.f32.mrb[0].mxu1 }
 0x13a   : > { %466 = vst.msk [vmem:[%s307_s9] sm:$0xff] %vm317_vm1, %v462_v23  ;;  %v744_v24 = vpop.f32.mrb[1].mxu1 }
 0x13f   : > { %v537_v25 = vpop.f32.mrb[2].mxu0 }
 0x140   : > { %541 = vst.msk [vmem:[%s311_s11] sm:$0xff] %vm317_vm1, %v537_v25  ;;  %v755_v26 = vpop.f32.mrb[3].mxu0 }
 0x141 PF: > { %s19_s21 = sadd.s32 1, %s916_s21  }
 0x142   : > { %p16_p5 = scmp.ge.s32.totalorder %s19_s21, 4  }
 0x144   :  { %18 = sbr.rel (!%p16_p5) target bundleno = 2 (0x2), region = 103 }
 0x14b   :  { %589 = vsyncpa [#allocation3], 1 }
 0x14c   :  { %591 = vsyncpa [#allocation3 + $0x1], 1 }
 0x14d   :  { %592 = vsyncpa [#allocation5], 1 }

// kernel: encoder_forward.9
= control target key start
LH: loop header
LB: loop body
LE: loop exit
PB: predicated region body
PF: predicated region fallthrough
CT: control target
= control target key end

     0   :  { %s925_s12 = smov 0   ;;  %s927_s13 = smov 0   ;;  %s997_s0 = inlined_call_operand.vmem [shape: f32[2,8,32], index: 0, kind: input, shape index: {}]   ;;  %s998_s1 = inlined_call_operand.vmem [shape: f32[2,8,32], index: 1, kind: input, shape index: {}]   ;;  %s999_s2 = inlined_call_operand.vmem [shape: f32[2,8,32], index: 2, kind: input, shape index: {}]   ;;  %s1000_s3 = inlined_call_operand.vmem [shape: f32[2,8,32], index: 3, kind: output, shape index: {}]  }
   0x1   :  { %s929_s14 = smov 0  }
   0x2 LB: > { %s32_s15 = sadd.s32 1, %s893_s13  ;;  %p790_p0 = scmp.ge.s32.totalorder %s897_s14, 1  ;;  %s897_s14 = sphi %s929_s14, %s13_s14   ;;  %s893_s13 = sphi %s927_s13, %s1002_s13   ;;  %s889_s12 = sphi %s925_s12, %s1001_s12  }
   0x3   : > { %p34_p1 = scmp.ge.s32.totalorder %s32_s15, 2  ;;  %p190_p2 = scmp.lt.s32.totalorder %s897_s14, 3 }
   0x5   : > { %s1004_s15 = smov (%p34_p1, %s32_s15), 0  ;;  %p191_p3 = pnand %p790_p0, %p190_p2 }
   0x6   : > { %p232_p4 = scmp.lt.s32.totalorder (!%p191_p3), %s889_s12, 1  ;;  %vm269_vm0 = vcmask (!%p191_p3), 130048   ;;  %v899_v0 = vmov (!%p191_p3), 0.0   ;;  %vm900_vm1 = vmmov (!%p191_p3), 0   ;;  %vm264_vm2 = vcmask (!%p191_p3), 7168   ;;  %s903_s23 = smov (!%p191_p3), 112  }
   0x7   : > { %194 = sbr.rel (%p191_p3) target bundleno = 1436 (0x59c), region = 32  ;;  %811 = vmatprep.subr.mxu0 (!%p191_p3), %v899_v0  ;;  %270 = vst.msk [vmem:[#allocation4] sm:$0xff] (!%p191_p3), %vm269_vm0, %v899_v0  ;;  %271 = vst.msk [vmem:[#allocation4 + $0x8] sm:$0xff] (!%p191_p3), %vm269_vm0, %v899_v0  ;;  %813 = vmatprep.mubr.msk.f32.mxu0 (!%p191_p3), %vm900_vm1, %v899_v0  ;;  %v901_v3 = vmov (!%p191_p3), -inf   ;;  %vm353_vm3 = vcmask (!%p191_p3), 64512   ;;  %v902_v7 = vmov (!%p191_p3), 0  }
   0x8   : > { %816 = vmatprep.subr.mxu1 (!%p191_p3), %v899_v0  ;;  %818 = vmatprep.mubr.msk.f32.mxu1 (!%p191_p3), %vm900_vm1, %v899_v0  ;;  %265 = vst.msk [vmem:[#allocation2] sm:$0xff] (!%p191_p3), %vm264_vm2, %v901_v3  ;;  %266 = vst.msk [vmem:[#allocation2 + $0x8] sm:$0xff] (!%p191_p3), %vm264_vm2, %v901_v3  ;;  %s904_s27 = smov (!%p191_p3), 16   ;;  %vm677_vm4 = vcmask (!%p191_p3), 261120  }
   0x9   : > { %267 = vst.msk [vmem:[#allocation3] sm:$0xff] (!%p191_p3), %vm264_vm2, %v899_v0  ;;  %268 = vst.msk [vmem:[#allocation3 + $0x8] sm:$0xff] (!%p191_p3), %vm264_vm2, %v899_v0  ;;  %861 = vset.pattern.permute.xlu0 (!%p191_p3), %v902_v7  ;;  %862 = vset.pattern.permute.xlu1 (!%p191_p3), %v902_v7 }
   0xe   : > { %s1006_s12 = smov (!%p232_p4, %s889_s12), 1  ;;  %v377_v50 = vld [vmem:[#allocation4] sm:$0xff]  ;;  %v564_v54 = vld [vmem:[#allocation4 + $0x8] sm:$0xff] }
   0xf   : > { %s947_s16 = sshll.u32 %s1006_s12, 3  ;;  %v352_v8 = vld [vmem:[#allocation2] sm:$0xff]  ;;  %v539_v24 = vld [vmem:[#allocation2 + $0x8] sm:$0xff] }
  0x10   : > { %s245_s19 = scalar_lea.vmem %s998_s1, %s947_s16  ;;  %s238_s22 = scalar_lea.vmem %s997_s0, %s947_s16  ;;  %v369_v39 = vld [vmem:[#allocation3] sm:$0xff]  ;;  %v556_v44 = vld [vmem:[#allocation3 + $0x8] sm:$0xff] }
  0x11   : > { %v273_v1 = vld [vmem:[%s245_s19] sm:$0xff]  ;;  %s252_s26 = scalar_lea.vmem %s999_s2, %s947_s16  ;;  %s259_s30 = scalar_lea.vmem %s1000_s3, %s947_s16 }
  0x12   : > { %812 = vmatpush3.xpose.msk.msra.mxu0 %vm269_vm0, %v273_v1  ;;  %v272_v2 = vld [vmem:[%s238_s22] sm:$0xff]  ;;  %462 = vrot.lane.b32.xlu1 %v273_v1, %s903_s23 }
  0x13   : > { %826 = vmatprep.subr.mxu0 %v899_v0  ;;  %v274_v12 = vld [vmem:[%s252_s26] sm:$0xff] }
  0x14   : > { %817 = vmatpush3.msra.mxu1 %v274_v12 }
  0x15   : > { %814 = vmatmul.mubr.msk.f32.vlgmr.msra.gmra.mrb[0].mxu0 %vm269_vm0, %v272_v2  ;;  %821 = vmatprep.subr.mxu1 %v899_v0 }
  0x16   : > { %828 = vmatprep.mubr.msk.f32.mxu0 %vm900_vm1, %v899_v0  ;;  %460 = vrot.lane.b32.xlu1 %v272_v2, %s903_s23 }
  0x84   : > { %v463_v16 = vpop.permute.xlu1 %462 }
  0x88   : > { %v461_v18 = vpop.permute.xlu1 %460 }
  0xe8   : > { %v348_v4 = vpop.f32.mrb[0].mxu0 }
  0xe9   : > { %v815_v5 = vpop.f32.mrb[1].mxu0  ;;  %v354_v6 = vsel %vm353_vm3, %v348_v4, -inf }
  0xea   : > { %355 = vmax.xlane.f32.xlu0 %v354_v6 }
 0x177   : > { %v356_v9 = vpop.xlane.xlu0 %355 }
 0x178   : > { %v357_v10 = vmax.f32 %v352_v8, %v356_v9 }
 0x17a   : > { %v358_v11 = vsub.f32 %v352_v8, %v357_v10  ;;  %459 = vst.msk [vmem:[#allocation2] sm:$0xff] %vm264_vm2, %v357_v10  ;;  %363 = vperm.xlu0 %861, %v357_v10  }
 0x17c   : > { %v359_v36 = vmul.f32 1.442695, %v358_v11 }
 0x17e   : > { %572 = vrot.lane.b32.xlu0 %v274_v12, %s903_s23 }
 0x1f9   : > { %v364_v13 = vpop.permute.xlu0 %363 }
 0x1fa   : > { %v366_v14 = vsub.f32 %v348_v4, %v364_v13 }
 0x1fc   : > { %v367_v15 = vmul.f32 1.442695, %v366_v14 }
 0x1fd   : > { %v573_v28 = vpop.permute.xlu0 %572 }
 0x1fe   : > { %863 = vpow2.f32 %v367_v15  ;;  %827 = vmatpush3.msra.mxu0 %v573_v28 }
 0x208   : > { %v864_v17 = vpop.eup %863 }
 0x209   : > { %819 = vmatmul.mubr.msk.f32.vlgmr.msra.gmra.mrb[0].mxu1 %vm353_vm3, %v864_v17  ;;  %v371_v29 = vsel %vm353_vm3, %v864_v17, 0.0 }
 0x20a   : > { %822 = vmatpush3.xpose.msk.msra.mxu1 %vm269_vm0, %v463_v16  ;;  %823 = vmatprep.mubr.msk.f32.mxu1 %vm900_vm1, %v899_v0 }
 0x20d   : > { %824 = vmatmul.mubr.msk.f32.vlgmr.msra.gmra.mrb[2].mxu1 %vm269_vm0, %v461_v18 }
 0x2dc   : > { %v453_v19 = vpop.f32.mrb[0].mxu1 }
 0x2dd   : > { %v820_v20 = vpop.f32.mrb[1].mxu1 }
 0x2e0   : > { %v534_v21 = vpop.f32.mrb[2].mxu1 }
 0x2e1   : > { %v825_v22 = vpop.f32.mrb[3].mxu1  ;;  %v540_v23 = vsel %vm353_vm3, %v534_v21, -inf }
 0x2e2   : > { %541 = vmax.xlane.f32.xlu1 %v540_v23 }
 0x36f   : > { %v542_v25 = vpop.xlane.xlu1 %541 }
 0x370   : > { %v543_v26 = vmax.f32 %v539_v24, %v542_v25 }
 0x372   : > { %v544_v27 = vsub.f32 %v539_v24, %v543_v26  ;;  %650 = vst.msk [vmem:[#allocation2 + $0x8] sm:$0xff] %vm264_vm2, %v543_v26  ;;  %549 = vperm.xlu1 %862, %v543_v26  }
 0x374   : > { %v545_v35 = vmul.f32 1.442695, %v544_v27 }
 0x396   : > { %372 = vadd.xlane.f32.xlu1 %v371_v29 }
 0x3f1   : > { %v550_v30 = vpop.permute.xlu1 %549 }
 0x3f2   : > { %v552_v31 = vsub.f32 %v534_v21, %v550_v30 }
 0x3f4   : > { %v553_v32 = vmul.f32 1.442695, %v552_v31 }
 0x3f6   : > { %865 = vpow2.f32 %v553_v32 }
 0x3f7   : > { %867 = vpow2.f32 %v545_v35 }
 0x3f8   : > { %869 = vpow2.f32 %v359_v36 }
 0x400   : > { %v866_v33 = vpop.eup %865 }
 0x401   : > { %829 = vmatmul.mubr.msk.f32.vlgmr.msra.gmra.mrb[2].mxu0 %vm353_vm3, %v866_v33  ;;  %v558_v34 = vsel %vm353_vm3, %v866_v33, 0.0  ;;  %v868_v37 = vpop.eup %867 }
 0x402   : > { %559 = vadd.xlane.f32.xlu0 %v558_v34  ;;  %v870_v38 = vpop.eup %869  ;;  %v557_v45 = vmul.f32 %v868_v37, %v556_v44 }
 0x403   : > { %v370_v40 = vmul.f32 %v870_v38, %v369_v39 }
 0x418   : > { %567 = vperm.xlu0 %861, %v868_v37  }
 0x41c   : > { %380 = vperm.xlu0 %861, %v870_v38  }
 0x423   : > { %v373_v41 = vpop.xlane.xlu1 %372 }
 0x424   : > { %v374_v42 = vadd.f32 %v373_v41, %v370_v40 }
 0x426   : > { %376 = vst.msk [vmem:[#allocation3] sm:$0xff] %vm264_vm2, %v374_v42 }
 0x42d   : > { %v655_v43 = vld [vmem:[#allocation3] sm:$0xff] }
 0x42e   : > { %658 = vperm.xlu0 %861, %v655_v43  }
 0x48f   : > { %v560_v46 = vpop.xlane.xlu0 %559 }
 0x490   : > { %v561_v47 = vadd.f32 %v560_v46, %v557_v45 }
 0x492   : > { %562 = vst.msk [vmem:[#allocation3 + $0x8] sm:$0xff] %vm264_vm2, %v561_v47 }
 0x497   : > { %v568_v48 = vpop.permute.xlu0 %567 }
 0x498   : > { %v570_v55 = vmul.f32 %v568_v48, %v564_v54 }
 0x499   : > { %v664_v49 = vld [vmem:[#allocation3 + $0x8] sm:$0xff] }
 0x49a   : > { %667 = vperm.xlu1 %862, %v664_v49  }
 0x49b   : > { %v381_v51 = vpop.permute.xlu0 %380 }
 0x49c   : > { %v383_v52 = vmul.f32 %v381_v51, %v377_v50 }
 0x49e   : > { %v457_v53 = vadd.f32 %v453_v19, %v383_v52 }
 0x4a0   : > { %458 = vst.msk [vmem:[#allocation4] sm:$0xff] %vm269_vm0, %v457_v53 }
 0x4a7   : > { %v654_v1 = vld [vmem:[#allocation4] sm:$0xff] }
 0x4ad   : > { %v659_v63 = vpop.permute.xlu0 %658 }
 0x4d4   : > { %v644_v56 = vpop.f32.mrb[2].mxu0 }
 0x4d5   : > { %v648_v57 = vadd.f32 %v644_v56, %v570_v55  ;;  %v830_v58 = vpop.f32.mrb[3].mxu0 }
 0x4d7   : > { %649 = vst.msk [vmem:[#allocation4 + $0x8] sm:$0xff] %vm269_vm0, %v648_v57 }
 0x4de   : > { %v663_v61 = vld [vmem:[#allocation4 + $0x8] sm:$0xff] }
 0x519   : > { %v668_v59 = vpop.permute.xlu1 %667 }
 0x51a   : > { %871 = vrcp.f32 %v668_v59 }
 0x51b   : > { %873 = vrcp.f32 %v659_v63 }
 0x524   : > { %v872_v60 = vpop.eup %871 }
 0x525   : > { %v671_v62 = vmul.f32 %v872_v60, %v663_v61  ;;  %v874_v0 = vpop.eup %873 }
 0x526   : > { %v662_v2 = vmul.f32 %v874_v0, %v654_v1 }
 0x527   : > { %673 = vrot.lane.b32.xlu0 %v671_v62, %s904_s27 }
 0x599   : > { %v674_v3 = vpop.permute.xlu0 %673 }
 0x59a   : > { %v676_v4 = vsel %vm269_vm0, %v662_v2, %v674_v3 }
 0x59b   : > { %678 = vst.msk [vmem:[%s259_s30] sm:$0xff] %vm677_vm4, %v676_v4 }
 0x59c PF: > { %s13_s14 = sadd.s32 1, %s897_s14   ;;  %s1001_s12 = smov %s893_s13 }
 0x59d   : > { %p10_p5 = scmp.ge.s32.totalorder %s13_s14, 4   ;;  %s1002_s13 = smov %s1004_s15 }
 0x59f   :  { %12 = sbr.rel (!%p10_p5) target bundleno = 2 (0x2), region = 79 }

// kernel: encoder_forward.11
= control target key start
LH: loop header
LB: loop body
LE: loop exit
PB: predicated region body
PF: predicated region fallthrough
CT: control target
= control target key end

     0   :  { %s743_s18 = smov 0   ;;  %s745_s19 = smov 0   ;;  %s833_s0 = inlined_call_operand.vmem [shape: f32[16,32], index: 0, kind: input, shape index: {}]   ;;  %s834_s1 = inlined_call_operand.vmem [shape: f32[32,64], index: 1, kind: input, shape index: {}]   ;;  %s835_s2 = inlined_call_operand.vmem [shape: f32[1,64], index: 2, kind: input, shape index: {}]   ;;  %s836_s3 = inlined_call_operand.vmem [shape: f32[64,32], index: 3, kind: input, shape index: {}]   ;;  %s837_s4 = inlined_call_operand.vmem [shape: f32[1,32], index: 4, kind: input, shape index: {}]   ;;  %s838_s5 = inlined_call_operand.vmem [shape: f32[16,32], index: 5, kind: output, shape index: {}]  }
   0x1   :  { %s747_s20 = smov 0  }
   0x2 LB: > { %s27_s21 = sadd.s32 1, %s704_s19  ;;  %p588_p0 = scmp.ge.s32.totalorder %s708_s20, 1  ;;  %s708_s20 = sphi %s747_s20, %s15_s20   ;;  %s704_s19 = sphi %s745_s19, %s840_s19   ;;  %s700_s18 = sphi %s743_s18, %s839_s18  }
   0x3   : > { %p29_p1 = scmp.ge.s32.totalorder %s27_s21, 2  ;;  %p226_p2 = scmp.lt.s32.totalorder %s708_s20, 3 }
   0x5   : > { %s842_s21 = smov (%p29_p1, %s27_s21), 0  ;;  %p227_p3 = pnand %p588_p0, %p226_p2 }
   0x6   : > { %v292_v0 = vld [vmem:[%s834_s1] sm:$0xff] (!%p227_p3)  ;;  %v293_v1 = vld [vmem:[%s834_s1 + $0x8] sm:$0xff] (!%p227_p3)  ;;  %v294_v2 = vld [vmem:[%s834_s1 + $0x10] sm:$0xff] (!%p227_p3)  ;;  %v710_v3 = vmov (!%p227_p3), 0.0|0.0   ;;  %vm711_vm0 = vmmov (!%p227_p3), 0   ;;  %v712_v6 = vmov (!%p227_p3), 0.0  }
   0x7   : > { %230 = sbr.rel (%p227_p3) target bundleno = 461 (0x1cd), region = 40  ;;  %641 = vmatprep.subr.bf16.mxu0 (!%p227_p3), %v710_v3  ;;  %v642_v4 = vpack.c.bf16 (!%p227_p3), %v293_v1, %v292_v0  ;;  %v295_v5 = vld [vmem:[%s834_s1 + $0x18] sm:$0xff] (!%p227_p3)  ;;  %619 = vmatprep.mubr.msk.f32.mxu0 (!%p227_p3), %vm711_vm0, %v712_v6  ;;  %p264_p4 = scmp.lt.s32.totalorder (!%p227_p3), %s700_s18, 1  ;;  %vm289_vm1 = vcmask (!%p227_p3), 261120   ;;  %v379_v7 = vld [vmem:[%s836_s3] sm:$0xff] (!%p227_p3)  ;;  %v380_v8 = vld [vmem:[%s836_s3 + $0x8] sm:$0xff] (!%p227_p3) }
   0x8   : > { %290 = vst.msk [vmem:[#allocation2] sm:$0xff] (!%p227_p3), %vm289_vm1, %v712_v6  ;;  %647 = vmatprep.subr.bf16.mxu1 (!%p227_p3), %v710_v3  ;;  %v648_v9 = vpack.c.bf16 (!%p227_p3), %v380_v8, %v379_v7  ;;  %v381_v10 = vld [vmem:[%s836_s3 + $0x10] sm:$0xff] (!%p227_p3)  ;;  %v382_v11 = vld [vmem:[%s836_s3 + $0x18] sm:$0xff] (!%p227_p3)  ;;  %638 = vmatprep.mubr.msk.f32.mxu1 (!%p227_p3), %vm711_vm0, %v712_v6  ;;  %v645_v12 = vpack.c.bf16 (!%p227_p3), %v295_v5, %v294_v2  ;;  %v383_v14 = vld [vmem:[%s836_s3 + $0x20] sm:$0xff] (!%p227_p3)  ;;  %vm387_vm2 = vcmask (!%p227_p3), 523264  }
   0x9   : > { %643 = vmatpush3.bf16.msra.mxu0 (!%p227_p3), %v642_v4  ;;  %v651_v13 = vpack.c.bf16 (!%p227_p3), %v382_v11, %v381_v10  ;;  %v384_v15 = vld [vmem:[%s836_s3 + $0x28] sm:$0xff] (!%p227_p3)  ;;  %v385_v18 = vld [vmem:[%s836_s3 + $0x30] sm:$0xff] (!%p227_p3)  ;;  %v386_v19 = vld [vmem:[%s836_s3 + $0x38] sm:$0xff] (!%p227_p3) }
   0xa   : > { %644 = vmatprep.subr.bf16.mxu0 (!%p227_p3), %v710_v3  ;;  %649 = vmatpush3.bf16.msra.mxu1 (!%p227_p3), %v648_v9  ;;  %v654_v17 = vpack.c.bf16 (!%p227_p3), %v384_v15, %v383_v14  ;;  %v657_v20 = vpack.c.bf16 (!%p227_p3), %v386_v19, %v385_v18  ;;  %v591_v21 = vld [vmem:[%s835_s2] ss:$0 sm:$0xff] (!%p227_p3) }
   0xb   : > { %650 = vmatprep.subr.bf16.mxu1 (!%p227_p3), %v710_v3  ;;  %v594_v30 = vld [vmem:[%s837_s4] ss:$0 sm:$0xff] (!%p227_p3) }
   0xd   : > { %646 = vmatpush3.bf16.msra.mxu0 (!%p227_p3), %v645_v12 }
   0xe   : > { %s844_s18 = smov (!%p264_p4, %s700_s18), 1  ;;  %652 = vmatpush3.bf16.msra.mxu1 %v651_v13 }
   0xf   : > { %s589_s13 = sshll.u32 %s844_s18, 3  ;;  %653 = vmatprep.subr.bf16.mxu1 %v710_v3  ;;  %v378_v26 = vld [vmem:[#allocation2] sm:$0xff] }
  0x10   : > { %s267_s24 = scalar_lea.vmem %s833_s0, %s589_s13  ;;  %s284_s10 = scalar_lea.vmem %s838_s5, %s589_s13 }
  0x11   : > { %v291_v16 = vld [vmem:[%s267_s24] sm:$0xff] }
  0x12   : > { %620 = vmatmul.mubr.msk.f32.vlgmr.msra.gmra.mrb[0].mxu0 %vm289_vm1, %v291_v16  ;;  %655 = vmatpush3.bf16.msra.mxu1 %v654_v17 }
  0x13   : > { %656 = vmatprep.subr.bf16.mxu1 %v710_v3 }
  0x16   : > { %658 = vmatpush3.bf16.msra.mxu1 %v657_v20 }
  0xe5   : > { %v373_v22 = vpop.f32.mrb[0].mxu0 }
  0xe6   : > { %v374_v23 = vadd.f32 %v591_v21, %v373_v22  ;;  %v621_v24 = vpop.f32.mrb[1].mxu0 }
  0xe8   : > { %v377_v25 = vmax.f32 %v374_v23, 0.0 }
  0xea   : > { %639 = vmatmul.mubr.msk.f32.vlgmr.msra.gmra.mrb[0].mxu1 %vm387_vm2, %v377_v25 }
 0x1bd   : > { %v457_v27 = vpop.f32.mrb[0].mxu1 }
 0x1be   : > { %v461_v28 = vadd.f32 %v457_v27, %v378_v26  ;;  %v640_v29 = vpop.f32.mrb[1].mxu1 }
 0x1c0   : > { %462 = vst.msk [vmem:[#allocation2] sm:$0xff] %vm289_vm1, %v461_v28 }
 0x1c7   : > { %v466_v31 = vld [vmem:[#allocation2] sm:$0xff] }
 0x1c8   : > { %v474_v32 = vadd.f32 %v594_v30, %v466_v31 }
 0x1ca   : > { %v475_v33 = vadd.f32 %v474_v32, %v291_v16 }
 0x1cc   : > { %476 = vst.msk [vmem:[%s284_s10] sm:$0xff] %vm289_vm1, %v475_v33 }
 0x1cd PF: > { %s15_s20 = sadd.s32 1, %s708_s20   ;;  %s839_s18 = smov %s704_s19 }
 0x1ce   : > { %p12_p5 = scmp.ge.s32.totalorder %s15_s20, 4   ;;  %s840_s19 = smov %s842_s21 }
 0x1d0   :  { %14 = sbr.rel (!%p12_p5) target bundleno = 2 (0x2), region = 87 }

// kernel: encoder_forward.12
= control target key start
LH: loop header
LB: loop body
LE: loop exit
PB: predicated region body
PF: predicated region fallthrough
CT: control target
= control target key end

     0   :  { %s750_s21 = smov 0   ;;  %s824_s0 = inlined_call_operand.vmem [shape: f32[16,32], index: 0, kind: input, shape index: {}]   ;;  %s825_s1 = inlined_call_operand.vmem [shape: f32[32,32], index: 1, kind: input, shape index: {}]   ;;  %s826_s2 = inlined_call_operand.vmem [shape: f32[32,32], index: 2, kind: input, shape index: {}]   ;;  %s827_s3 = inlined_call_operand.vmem [shape: f32[32,32], index: 3, kind: input, shape index: {}]   ;;  %s828_s4 = inlined_call_operand.vmem [shape: f32[16,32], index: 4, kind: output, shape index: {0}]   ;;  %s829_s5 = inlined_call_operand.vmem [shape: f32[16,32], index: 5, kind: output, shape index: {1}]   ;;  %s830_s6 = inlined_call_operand.vmem [shape: f32[16,32], index: 6, kind: output, shape index: {2}]  }
   0x1 LB: > { %s613_s22 = sadd.s32 4294967295, %s710_s21   ;;  %p617_p0 = scmp.ge.s32.totalorder %s710_s21, 1  ;;  %s710_s21 = sphi %s750_s21, %s17_s21  }
   0x2   : > { %p216_p1 = scmp.lt.s32.totalorder %s710_s21, 3 }
   0x4   : > { %p217_p2 = pnand %p617_p0, %p216_p1 }
   0x5   : > { %v269_v0 = vld [vmem:[%s825_s1] sm:$0xff] (!%p217_p2)  ;;  %v270_v1 = vld [vmem:[%s825_s1 + $0x8] sm:$0xff] (!%p217_p2)  ;;  %v271_v2 = vld [vmem:[%s825_s1 + $0x10] sm:$0xff] (!%p217_p2)  ;;  %v712_v3 = vmov (!%p217_p2), 0.0|0.0   ;;  %vm713_vm0 = vmmov (!%p217_p2), 0   ;;  %v714_v6 = vmov (!%p217_p2), 0.0  }
   0x6   : > { %220 = sbr.rel (%p217_p2) target bundleno = 238 (0xee), region = 36  ;;  %675 = vmatprep.subr.bf16.mxu0 (!%p217_p2), %v712_v3  ;;  %v676_v4 = vpack.c.bf16 (!%p217_p2), %v270_v1, %v269_v0  ;;  %v272_v5 = vld [vmem:[%s825_s1 + $0x18] sm:$0xff] (!%p217_p2)  ;;  %650 = vmatprep.mubr.msk.f32.mxu0 (!%p217_p2), %vm713_vm0, %v714_v6  ;;  %p252_p3 = scmp.lt.s32.totalorder (!%p217_p2), %s613_s22, 1  ;;  %v348_v7 = vld [vmem:[%s826_s2] sm:$0xff] (!%p217_p2)  ;;  %v349_v8 = vld [vmem:[%s826_s2 + $0x8] sm:$0xff] (!%p217_p2)  ;;  %vm273_vm1 = vcmask (!%p217_p2), 261120  }
   0x7   : > { %681 = vmatprep.subr.bf16.mxu1 (!%p217_p2), %v712_v3  ;;  %v682_v9 = vpack.c.bf16 (!%p217_p2), %v349_v8, %v348_v7  ;;  %v350_v10 = vld [vmem:[%s826_s2 + $0x10] sm:$0xff] (!%p217_p2)  ;;  %661 = vmatprep.mubr.msk.f32.mxu1 (!%p217_p2), %vm713_vm0, %v714_v6  ;;  %v679_v11 = vpack.c.bf16 (!%p217_p2), %v272_v5, %v271_v2  ;;  %v351_v12 = vld [vmem:[%s826_s2 + $0x18] sm:$0xff] (!%p217_p2)  ;;  %v423_v13 = vld [vmem:[%s827_s3] sm:$0xff] (!%p217_p2) }
   0x8   : > { %677 = vmatpush3.bf16.msra.mxu0 (!%p217_p2), %v676_v4  ;;  %v424_v14 = vld [vmem:[%s827_s3 + $0x8] sm:$0xff] (!%p217_p2)  ;;  %v685_v15 = vpack.c.bf16 (!%p217_p2), %v351_v12, %v350_v10  ;;  %v425_v18 = vld [vmem:[%s827_s3 + $0x10] sm:$0xff] (!%p217_p2)  ;;  %v426_v19 = vld [vmem:[%s827_s3 + $0x18] sm:$0xff] (!%p217_p2) }
   0x9   : > { %678 = vmatprep.subr.bf16.mxu0 (!%p217_p2), %v712_v3  ;;  %683 = vmatpush3.bf16.msra.mxu1 (!%p217_p2), %v682_v9  ;;  %v688_v17 = vpack.c.bf16 (!%p217_p2), %v424_v14, %v423_v13  ;;  %v691_v20 = vpack.c.bf16 (!%p217_p2), %v426_v19, %v425_v18 }
   0xa   : > { %684 = vmatprep.subr.bf16.mxu1 (!%p217_p2), %v712_v3 }
   0xc   : > { %680 = vmatpush3.bf16.msra.mxu0 (!%p217_p2), %v679_v11 }
   0xd   : > { %s832_s22 = smov (!%p252_p3, %s613_s22), 1  ;;  %687 = vmatprep.subr.bf16.mxu0 %v712_v3  ;;  %686 = vmatpush3.bf16.msra.mxu1 %v685_v15 }
   0xe   : > { %s790_s19 = sshll.u32 %s832_s22, 3 }
   0xf   : > { %s255_s24 = scalar_lea.vmem %s824_s0, %s790_s19  ;;  %s259_s30 = scalar_lea.vmem %s828_s4, %s790_s19 }
  0x10   : > { %v268_v16 = vld [vmem:[%s255_s24] sm:$0xff]  ;;  %s263_s9 = scalar_lea.vmem %s829_s5, %s790_s19  ;;  %s267_s12 = scalar_lea.vmem %s830_s6, %s790_s19 }
  0x11   : > { %651 = vmatmul.mubr.msk.f32.vlgmr.msra.gmra.mrb[0].mxu0 %vm273_vm1, %v268_v16  ;;  %662 = vmatmul.mubr.msk.f32.vlgmr.msra.gmra.mrb[0].mxu1 %vm273_vm1, %v268_v16 }
  0x12   : > { %689 = vmatpush3.bf16.msra.mxu0 %v688_v17  ;;  %672 = vmatprep.mubr.msk.f32.mxu0 %vm713_vm0, %v714_v6 }
  0x13   : > { %690 = vmatprep.subr.bf16.mxu0 %v712_v3 }
  0x16   : > { %692 = vmatpush3.bf16.msra.mxu0 %v691_v20 }
  0x19   : > { %673 = vmatmul.mubr.msk.f32.vlgmr.msra.gmra.mrb[2].mxu0 %vm273_vm1, %v268_v16 }
  0xe4   : > { %v343_v21 = vpop.f32.mrb[0].mxu0  ;;  %v418_v23 = vpop.f32.mrb[0].mxu1 }
  0xe5   : > { %347 = vst.msk [vmem:[%s259_s30] sm:$0xff] %vm273_vm1, %v343_v21  ;;  %v652_v22 = vpop.f32.mrb[1].mxu0  ;;  %422 = vst.msk [vmem:[%s263_s9] sm:$0xff] %vm273_vm1, %v418_v23  ;;  %v663_v24 = vpop.f32.mrb[1].mxu1 }
  0xec   : > { %v493_v25 = vpop.f32.mrb[2].mxu0 }
  0xed   : > { %497 = vst.msk [vmem:[%s267_s12] sm:$0xff] %vm273_vm1, %v493_v25  ;;  %v674_v26 = vpop.f32.mrb[3].mxu0 }
  0xee PF: > { %s17_s21 = sadd.s32 1, %s710_s21  }
  0xef   : > { %p14_p4 = scmp.ge.s32.totalorder %s17_s21, 4  }
  0xf1   :  { %16 = sbr.rel (!%p14_p4) target bundleno = 1 (0x1), region = 90 }

// kernel: encoder_forward.15
= control target key start
LH: loop header
LB: loop body
LE: loop exit
PB: predicated region body
PF: predicated region fallthrough
CT: control target
= control target key end

     0   :  { %10 = vsyncpa [#allocation4], 0  ;;  %s1010_s0 = inlined_call_operand.vmem [shape: f32[16,32], index: 0, kind: input, shape index: {}]   ;;  %s1011_s1 = inlined_call_operand.vmem [shape: f32[32,64], index: 1, kind: input, shape index: {}]   ;;  %s1012_s2 = inlined_call_operand.vmem [shape: f32[1,64], index: 2, kind: input, shape index: {}]   ;;  %s1013_s3 = inlined_call_operand.vmem [shape: f32[64,32], index: 3, kind: input, shape index: {}]   ;;  %s1014_s4 = inlined_call_operand.vmem [shape: f32[1,32], index: 4, kind: input, shape index: {}]   ;;  %s1015_s5 = inlined_call_operand.hbm [shape: f32[16,32], index: 5, kind: output, shape index: {}]  }
   0x1   :  { %12 = vsyncpa [#allocation4 + $0x1], 0  ;;  %s852_s18 = smov 0   ;;  %s854_s19 = smov 0  }
   0x2   :  { %s856_s20 = smov 0   ;;  %s858_s21 = smov 0  }
   0x3   :  { %s860_s22 = smov 0   ;;  %s862_s23 = smov 0  }
   0x4 LB: > { %s600_s24 = sadd.s32 4294967295, %s816_s23   ;;  %s601_s25 = sadd.s32 4294967294, %s816_s23   ;;  %s816_s23 = sphi %s862_s23, %s18_s23   ;;  %s812_s22 = sphi %s860_s22, %s1022_s22   ;;  %s808_s21 = sphi %s858_s21, %s1021_s21   ;;  %s804_s20 = sphi %s856_s20, %s1020_s20   ;;  %s800_s19 = sphi %s854_s19, %s1019_s19   ;;  %s796_s18 = sphi %s852_s18, %s1018_s18  }
   0x5   : > { %s30_s26 = sadd.s32 1, %s812_s22  ;;  %s162_s27 = sadd.s32 1, %s804_s20 }
   0x6   : > { %p32_p0 = scmp.ge.s32.totalorder %s30_s26, 2  ;;  %p172_p1 = scmp.ne.s32.totalorder %s804_s20, %s800_s19 }
   0x7   : > { %p173_p2 = scmp.eq.s32.totalorder %s600_s24, 1  ;;  %p178_p3 = scmp.ne.s32.totalorder %s800_s19, %s796_s18 }
   0x8   : > { %s1024_s26 = smov (%p32_p0, %s30_s26), 0  ;;  %p179_p5 = scmp.eq.s32.totalorder %s601_s25, 1 }
   0x9   : > { %p892_p4 = por %p173_p2, %p172_p1  ;;  %s159_s29 = ssub.s32 %s812_s22, %s1024_s26 }
   0xa   : > { %p607_p6 = scmp.ge.s32.totalorder %s816_s23, 1  ;;  %p160_p7 = scmp.eq.s32.totalorder %s159_s29, 0 }
   0xb   : > { %p899_p8 = por %p179_p5, %p178_p3  ;;  %p229_p9 = scmp.lt.s32.totalorder %s816_s23, 3 }
   0xc   : > { %s905_s6 = scalar_select %p160_p7, %s804_s20, %s162_s27  }
   0xd   : > { %p230_p10 = pnand %p607_p6, %p229_p9 }
   0xe   : > { %v292_v0 = vld [vmem:[%s1011_s1] sm:$0xff] (!%p230_p10)  ;;  %v293_v1 = vld [vmem:[%s1011_s1 + $0x8] sm:$0xff] (!%p230_p10)  ;;  %v294_v2 = vld [vmem:[%s1011_s1 + $0x10] sm:$0xff] (!%p230_p10)  ;;  %v818_v3 = vmov (!%p230_p10), 0.0|0.0   ;;  %vm819_vm0 = vmmov (!%p230_p10), 0   ;;  %v820_v6 = vmov (!%p230_p10), 0.0  }
   0xf   : > { %233 = sbr.rel (%p230_p10) target bundleno = 483 (0x1e3), region = 40  ;;  %662 = vmatprep.subr.bf16.mxu0 (!%p230_p10), %v818_v3  ;;  %v663_v4 = vpack.c.bf16 (!%p230_p10), %v293_v1, %v292_v0  ;;  %v295_v5 = vld [vmem:[%s1011_s1 + $0x18] sm:$0xff] (!%p230_p10)  ;;  %640 = vmatprep.mubr.msk.f32.mxu0 (!%p230_p10), %vm819_vm0, %v820_v6  ;;  %p268_p11 = scmp.lt.s32.totalorder (!%p230_p10), %s808_s21, 1  ;;  %vm289_vm1 = vcmask (!%p230_p10), 261120   ;;  %v379_v7 = vld [vmem:[%s1013_s3] sm:$0xff] (!%p230_p10)  ;;  %v380_v8 = vld [vmem:[%s1013_s3 + $0x8] sm:$0xff] (!%p230_p10) }
  0x10   : > { %290 = vst.msk [vmem:[#allocation2] sm:$0xff] (!%p230_p10), %vm289_vm1, %v820_v6  ;;  %668 = vmatprep.subr.bf16.mxu1 (!%p230_p10), %v818_v3  ;;  %v669_v9 = vpack.c.bf16 (!%p230_p10), %v380_v8, %v379_v7  ;;  %v381_v10 = vld [vmem:[%s1013_s3 + $0x10] sm:$0xff] (!%p230_p10)  ;;  %v382_v11 = vld [vmem:[%s1013_s3 + $0x18] sm:$0xff] (!%p230_p10)  ;;  %659 = vmatprep.mubr.msk.f32.mxu1 (!%p230_p10), %vm819_vm0, %v820_v6  ;;  %v666_v12 = vpack.c.bf16 (!%p230_p10), %v295_v5, %v294_v2  ;;  %v383_v14 = vld [vmem:[%s1013_s3 + $0x20] sm:$0xff] (!%p230_p10)  ;;  %vm387_vm2 = vcmask (!%p230_p10), 523264   ;;  %s615_s12 = sshll.u32 (!%p230_p10), %s808_s21, 7 }
  0x11   : > { %664 = vmatpush3.bf16.msra.mxu0 (!%p230_p10), %v663_v4  ;;  %v672_v13 = vpack.c.bf16 (!%p230_p10), %v382_v11, %v381_v10  ;;  %v384_v15 = vld [vmem:[%s1013_s3 + $0x28] sm:$0xff] (!%p230_p10)  ;;  %v385_v18 = vld [vmem:[%s1013_s3 + $0x30] sm:$0xff] (!%p230_p10)  ;;  %v386_v19 = vld [vmem:[%s1013_s3 + $0x38] sm:$0xff] (!%p230_p10)  ;;  %s962_s17 = scalar_lea.hbm (!%p230_p10), %s1015_s5, %s615_s12 }
  0x12   : > { %665 = vmatprep.subr.bf16.mxu0 (!%p230_p10), %v818_v3  ;;  %670 = vmatpush3.bf16.msra.mxu1 (!%p230_p10), %v669_v9  ;;  %v675_v17 = vpack.c.bf16 (!%p230_p10), %v384_v15, %v383_v14  ;;  %v678_v20 = vpack.c.bf16 (!%p230_p10), %v386_v19, %v385_v18  ;;  %v610_v21 = vld [vmem:[%s1012_s2] ss:$0 sm:$0xff] (!%p230_p10) }
  0x13   : > { %671 = vmatprep.subr.bf16.mxu1 (!%p230_p10), %v818_v3  ;;  %v613_v30 = vld [vmem:[%s1014_s4] ss:$0 sm:$0xff] (!%p230_p10) }
  0x15   : > { %667 = vmatpush3.bf16.msra.mxu0 (!%p230_p10), %v666_v12 }
  0x16   : > { %s269_s8 = scalar_select %p268_p11, %s808_s21, 1  ;;  %673 = vmatpush3.bf16.msra.mxu1 %v672_v13 }
  0x17   : > { %674 = vmatprep.subr.bf16.mxu1 %v818_v3  ;;  %v378_v26 = vld [vmem:[#allocation2] sm:$0xff]  ;;  %s821_s21 = smov [#allocation3]  }
  0x18   : > { %s609_s9 = sshll.u32 %s269_s8, 3  ;;  %s265_s8 = sand.u32 1, %s800_s19  }
  0x19   : > { %s271_s16 = scalar_lea.vmem %s1010_s0, %s609_s9  ;;  %s608_s9 = sshll.u32 %s265_s8, 3 }
  0x1a   : > { %v291_v16 = vld [vmem:[%s271_s16] sm:$0xff]  ;;  %676 = vmatpush3.bf16.msra.mxu1 %v675_v17  ;;  %s267_s13 = scalar_lea.vmem [#allocation3], %s608_s9  ;;  %s478_s24 = scalar_lea.sflag [#allocation4], %s265_s8 }
  0x1b   : > { %641 = vmatmul.mubr.msk.f32.vlgmr.msra.gmra.mrb[0].mxu0 %vm289_vm1, %v291_v16  ;;  %677 = vmatprep.subr.bf16.mxu1 %v818_v3  ;;  %s491_s14 = sshll.u32 %s267_s13, 4  ;;  %s742_s27 = sshll.u32 %s821_s21, 4  ;;  %s964_s14 = int_to_ptr.vmem [resolvable:$true] %s491_s14  ;;  %s743_s27 = int_to_ptr.vmem [resolvable:$false] %s742_s27 }
  0x1c   : > { %s738_s25 = scalar_lea.vmem %s964_s14, 128  ;;  %s744_s29 = scalar_lea.vmem %s743_s27, 256 }
  0x1d   : > { %p739_p12 = scmp.ne.s32.totalorder %s964_s14, %s738_s25  ;;  %p745_p1 = scmp.lt.s32.totalorder %s964_s14, %s743_s27 }
  0x1e   : > { %679 = vmatpush3.bf16.msra.mxu1 %v678_v20  ;;  %p746_p2 = scmp.lt.s32.totalorder %s744_s29, %s738_s25 }
  0x1f   : > { %p740_p13 = pnand %p739_p12, %p892_p4 }
  0x20   : > { %p747_p3 = por %p746_p2, %p745_p1 }
  0x21   : > { %p741_p0 = pneg %p740_p13 }
  0x23   : > { %p748_p5 = pnand %p747_p3, %p741_p0 }
  0xee   : > { %v373_v22 = vpop.f32.mrb[0].mxu0 }
  0xef   : > { %v374_v23 = vadd.f32 %v610_v21, %v373_v22  ;;  %v642_v24 = vpop.f32.mrb[1].mxu0 }
  0xf1   : > { %v377_v25 = vmax.f32 %v374_v23, 0.0 }
  0xf3   : > { %660 = vmatmul.mubr.msk.f32.vlgmr.msra.gmra.mrb[0].mxu1 %vm387_vm2, %v377_v25 }
 0x1c6   : > { %v457_v27 = vpop.f32.mrb[0].mxu1 }
 0x1c7   : > { %v461_v28 = vadd.f32 %v457_v27, %v378_v26  ;;  %v661_v29 = vpop.f32.mrb[1].mxu1 }
 0x1c9   : > { %462 = vst.msk [vmem:[#allocation2] sm:$0xff] %vm289_vm1, %v461_v28 }
 0x1d0   : > { %v466_v31 = vld [vmem:[#allocation2] sm:$0xff] }
 0x1d1   : > { %v474_v32 = vadd.f32 %v613_v30, %v466_v31 }
 0x1d3   : > { %v475_v33 = vadd.f32 %v474_v32, %v291_v16 }
 0x1d5   : > { %476 = vst.msk [vmem:[%s267_s13] sm:$0xff] %vm289_vm1, %v475_v33 }
 0x1d6   : > { %751 = shalt.err (!%p748_p5)
}
 0x1d7   : > { %s752_s7 = scalar_lea.hbm %s962_s17, 128  ;;  %s756_s10 = scalar_lea.hbm %s1015_s5, 256 }
 0x1d8   : > { %p753_p6 = scmp.ne.s32.totalorder %s962_s17, %s752_s7  ;;  %p757_p10 = scmp.lt.u32.totalorder %s962_s17, %s1015_s5 }
 0x1d9   : > { %p758_p11 = scmp.lt.u32.totalorder %s756_s10, %s752_s7  ;;  %p760_p13 = scmp.lt.u32.totalorder %s752_s7, %s962_s17 }
 0x1da   : > { %p754_p7 = pnand %p753_p6, %p892_p4 }
 0x1db   : > { %p759_p12 = por %p758_p11, %p757_p10 }
 0x1dc   : > { %p755_p9 = pneg %p754_p7 }
 0x1dd   : > { %p761_p0 = por %p760_p13, %p759_p12 }
 0x1df   : > { %p762_p1 = pnand %p761_p0, %p755_p9 }
 0x1e1   : > { %765 = shalt.err (!%p762_p1)
}
 0x1e2   : > { %680 = dma.vmem_to_hbm [thread:$0]  (%p892_p4), %s964_s14, 128, %s962_s17, %s478_s24  }
 0x1e3 PF: > { %p686_p2 = scmp.ge.s32.totalorder %s816_s23, 2  ;;  %s503_s13 = sand.u32 1, %s796_s18  }
 0x1e4   : > { %s504_s15 = scalar_lea.sflag [#allocation4], %s503_s13 }
 0x1e5   : > { %p683_p3 = pnand %p686_p2, %p899_p8 }
 0x1e7   : > { %791 = dma.done.wait (!%p683_p3), %s504_s15, 128  }
 0x1e8   : > { %793 = vsyncadd (!%p683_p3), %s504_s15, 4294967168  ;;  %s18_s23 = sadd.s32 1, %s816_s23   ;;  %s1018_s18 = smov %s800_s19 }
 0x1e9   : > { %p15_p5 = scmp.ge.s32.totalorder %s18_s23, 4   ;;  %s1019_s19 = smov %s804_s20 }
 0x1ea   : > { %s1020_s20 = smov %s905_s6  ;;  %s1021_s21 = smov %s812_s22 }
 0x1eb   : > { %s1022_s22 = smov %s1024_s26  ;;  %17 = sbr.rel (!%p15_p5) target bundleno = 4 (0x4), region = 92 }
 0x1f2   :  { %509 = vsyncpa [#allocation4], 1 }
 0x1f3   :  { %511 = vsyncpa [#allocation4 + $0x1], 1 }

</bundles_post_ra>
